<compile_context>
chip_gen: v6e
topology: v6e:2x2x1
jax: 0.10.0
libtpu: 0.0.40
codegen_flags: <defaults>
</compile_context>

<pallas_src>
import functools

import jax
import jax.numpy as jnp
from jax import lax
from jax.experimental import pallas as pl
from jax.experimental.pallas import tpu as pltpu


# ---------------------------------------------------------------------------
# kernel 1: fused im2col matmul + BN bias + ReLU + per-block max
# ---------------------------------------------------------------------------
def _conv_bias_relu_kernel(x_ref, w_ref, b_ref, y_ref, m_ref):
    # x_ref: (1, R, Kt) bf16   im2col patch rows for this (batch, row-tile)
    # w_ref: (Kt, Cp)   bf16   BN-folded, fake-quantized weights (Cp padded)
    # b_ref: (1, Cp)    f32    BN-folded bias (zero on padded channels)
    acc = jnp.dot(x_ref[0], w_ref[...], preferred_element_type=jnp.float32)
    y = jnp.maximum(acc + b_ref[...], 0.0)          # bias + ReLU, f32
    y_ref[0] = y
    # per-(batch, row-tile) max for the QuantAct range (y >= 0 after ReLU and
    # padded channels are exactly 0, so padding never affects the max)
    m_ref[...] = jnp.broadcast_to(jnp.max(y), (1, 1, 1, 1))


# ---------------------------------------------------------------------------
# kernel 2: QuantAct fake-quantization on a flat lane-dense view
# ---------------------------------------------------------------------------
def _quant_act_kernel(scale_ref, y_ref, o_ref, *, n_levels):
    s = scale_ref[0]                                # f32 scalar from SMEM
    inv_s = 1.0 / s
    q = jnp.clip(jnp.round(y_ref[...] * inv_s), -n_levels, n_levels)
    o_ref[...] = q * s


# ---------------------------------------------------------------------------
# small tiling helpers (pure Python, trace-time)
# ---------------------------------------------------------------------------
def _round_up(v, m):
    return (v + m - 1) // m * m


def _pick_conv_row_tile(oh, ow, cap_rows):
    """Largest TOH dividing OH with TOH*OW <= cap_rows and TOH*OW % 8 == 0."""
    for toh in range(oh, 0, -1):
        if oh % toh == 0 and toh * ow <= cap_rows and (toh * ow) % 8 == 0:
            return toh
    return oh          # full extent is always a legal block shape


def _pick_quant_row_tile(rows, cap_rows):
    for tr in range(min(rows, cap_rows), 0, -1):
        if rows % tr == 0 and tr % 8 == 0:
            return tr
    return rows        # full extent is always a legal block shape


# ---------------------------------------------------------------------------
# public wrapper (NCHW in / NCHW out, matching the PyTorch module)
# ---------------------------------------------------------------------------
def q_incept_conv(x_nchw, a_sf_in, params, *, stride, padding, eps=1e-5,
                  bit=8, max_rows_per_block=1024):
    del a_sf_in  # TODO(synk): only consumed by HAWQ's integer-only rescale path
    w_oihw = params["conv_weight"]                      # (Cout, Cin, KH, KW)
    gamma, beta = params["bn_gamma"], params["bn_beta"]
    mean, var = params["bn_mean"], params["bn_var"]

    Cout, Cin, KH, KW = w_oihw.shape
    SH, SW = stride
    PH, PW = padding
    N, _, H, W = x_nchw.shape
    OH = (H + 2 * PH - KH) // SH + 1
    OW = (W + 2 * PW - KW) // SW + 1
    Kt = KH * KW * Cin
    Cp = _round_up(Cout, 128)                           # lane-dense channels
    n_levels = float(2 ** (bit - 1) - 1)                # 127 for 8-bit

    # --- BN folding + per-channel symmetric weight fake-quant (param glue) ---
    inv_std = gamma / jnp.sqrt(var + eps)
    w_fold = w_oihw * inv_std[:, None, None, None]
    b_fold = beta - mean * inv_std
    w_absmax = jnp.max(jnp.abs(w_fold.reshape(Cout, -1)), axis=1)
    w_sf = jnp.maximum(w_absmax, 1e-8) / n_levels       # weight scaling factor
    w_q = (jnp.clip(jnp.round(w_fold / w_sf[:, None, None, None]),
                    -n_levels, n_levels) * w_sf[:, None, None, None])

    # weights -> (Kt, Cp) bf16 (contraction order kh, kw, cin); bias -> (1, Cp)
    w_hwio = jnp.transpose(w_q, (2, 3, 1, 0))
    w_hwio = jnp.pad(w_hwio, ((0, 0), (0, 0), (0, 0), (0, Cp - Cout)))
    w_mat = w_hwio.reshape(Kt, Cp).astype(jnp.bfloat16)
    bias = jnp.pad(b_fold, (0, Cp - Cout)).reshape(1, Cp).astype(jnp.float32)

    # --- NCHW -> NHWC, pad, im2col (strided gathers handled here, glue) ---
    x_nhwc = jnp.transpose(x_nchw, (0, 2, 3, 1)).astype(jnp.float32)
    xp = jnp.pad(x_nhwc, ((0, 0), (PH, PH), (PW, PW), (0, 0)))
    cols = []
    for kh in range(KH):
        for kw in range(KW):
            cols.append(lax.slice(
                xp, (0, kh, kw, 0),
                (N, kh + SH * (OH - 1) + 1, kw + SW * (OW - 1) + 1, Cin),
                (1, SH, SW, 1)))
    x_cols = jnp.concatenate(cols, axis=-1)             # (N, OH, OW, Kt)
    x_cols = x_cols.reshape(N, OH * OW, Kt).astype(jnp.bfloat16)

    # --- kernel 1: conv (one MXU matmul per block) + bias + ReLU + max ---
    TOH = _pick_conv_row_tile(OH, OW, max_rows_per_block)
    R = TOH * OW
    n_t = OH // TOH
    y_pad, y_max = pl.pallas_call(
        _conv_bias_relu_kernel,
        out_shape=(
            jax.ShapeDtypeStruct((N, OH * OW, Cp), jnp.float32),
            jax.ShapeDtypeStruct((N, n_t, 1, 1), jnp.float32),
        ),
        grid=(N, n_t),
        in_specs=[
            pl.BlockSpec((1, R, Kt), lambda n, t: (n, t, 0)),
            pl.BlockSpec((Kt, Cp), lambda n, t: (0, 0)),
            pl.BlockSpec((1, Cp), lambda n, t: (0, 0)),
        ],
        out_specs=(
            pl.BlockSpec((1, R, Cp), lambda n, t: (n, t, 0)),
            pl.BlockSpec((1, 1, 1, 1), lambda n, t: (n, t, 0, 0)),
        ),
        compiler_params=pltpu.CompilerParams(
            dimension_semantics=("parallel", "parallel"),
            vmem_limit_bytes=32 * 1024 * 1024),
    )(x_cols, w_mat, bias)

    # activation scaling factor from the tiny per-block max tensor
    a_sf = jnp.maximum(jnp.max(y_max), 1e-8) / n_levels
    scale = a_sf.reshape(1).astype(jnp.float32)

    # --- kernel 2: QuantAct on a flat lane-dense (rows, Cp) view ---
    rows = N * OH * OW
    y2d = y_pad.reshape(rows, Cp)
    cap = max(8, (2 * 1024 * 1024) // (Cp * 4))         # ~2 MiB per block
    TR = _pick_quant_row_tile(rows, cap)
    y_q2d = pl.pallas_call(
        functools.partial(_quant_act_kernel, n_levels=n_levels),
        out_shape=jax.ShapeDtypeStruct((rows, Cp), jnp.float32),
        grid=(rows // TR,),
        in_specs=[
            pl.BlockSpec(memory_space=pltpu.MemorySpace.SMEM),  # scalar scale
            pl.BlockSpec((TR, Cp), lambda r: (r, 0)),
        ],
        out_specs=pl.BlockSpec((TR, Cp), lambda r: (r, 0)),
        input_output_aliases={1: 0},                    # y is dead afterwards
        compiler_params=pltpu.CompilerParams(
            dimension_semantics=("parallel",),
            vmem_limit_bytes=32 * 1024 * 1024),
    )(scale, y2d)

    # strip channel padding, back to NCHW (glue)
    y_q = jnp.transpose(y_q2d.reshape(N, OH, OW, Cp)[..., :Cout], (0, 3, 1, 2))
    return y_q, a_sf.reshape(1)


# ---------------------------------------------------------------------------
# pure-JAX reference (same math, f32, XLA conv) for a sanity check
# ---------------------------------------------------------------------------
def _reference(x_nchw, params, *, stride, padding, eps=1e-5, bit=8):
    w = params["conv_weight"]
    Cout = w.shape[0]
    n_levels = float(2 ** (bit - 1) - 1)
    inv_std = params["bn_gamma"] / jnp.sqrt(params["bn_var"] + eps)
    w_fold = w * inv_std[:, None, None, None]
    b_fold = params["bn_beta"] - params["bn_mean"] * inv_std
    w_absmax = jnp.max(jnp.abs(w_fold.reshape(Cout, -1)), axis=1)
    w_sf = jnp.maximum(w_absmax, 1e-8) / n_levels
    w_q = (jnp.clip(jnp.round(w_fold / w_sf[:, None, None, None]),
                    -n_levels, n_levels) * w_sf[:, None, None, None])
    y = lax.conv_general_dilated(
        x_nchw, w_q, window_strides=stride,
        padding=[(padding[0], padding[0]), (padding[1], padding[1])],
        dimension_numbers=("NCHW", "OIHW", "NCHW"))
    y = jnp.maximum(y + b_fold[None, :, None, None], 0.0)
    a_sf = jnp.maximum(jnp.max(y), 1e-8) / n_levels
    y_q = jnp.clip(jnp.round(y / a_sf), -n_levels, n_levels) * a_sf
    return y_q, a_sf.reshape(1)


if __name__ == "__main__":
    key = jax.random.PRNGKey(0)
    N, Cin, H, W = 2, 4, 16, 16
    Cout, K = 8, 3

    ks = jax.random.split(key, 6)
    x = jax.random.normal(ks[0], (N, Cin, H, W), jnp.float32)
    a_sf_in = jnp.array([0.1], jnp.float32)  # incoming activation scaling factor
    params = {
        "conv_weight": 0.1 * jax.random.normal(ks[1], (Cout, Cin, K, K),
                                               jnp.float32),
        "bn_gamma": 1.0 + 0.1 * jax.random.normal(ks[2], (Cout,), jnp.float32),
        "bn_beta": 0.1 * jax.random.normal(ks[3], (Cout,), jnp.float32),
        "bn_mean": 0.1 * jax.random.normal(ks[4], (Cout,), jnp.float32),
        "bn_var": jnp.abs(jax.random.normal(ks[5], (Cout,), jnp.float32)) + 0.5,
    }

    # configs: (stride, padding, max_rows_per_block) — default single row-tile,
    # forced spatial row-tiling, and a stride-2 reduction-style conv.
    configs = [
        ((1, 1), (1, 1), 1024),
        ((1, 1), (1, 1), 128),
        ((2, 2), (0, 0), 1024),
    ]
    for stride, padding, max_rows in configs:
        fn = jax.jit(functools.partial(q_incept_conv, stride=stride,
                                       padding=padding,
                                       max_rows_per_block=max_rows))
        y, a_sf = fn(x, a_sf_in, params)
        jax.block_until_ready((y, a_sf))

        y_ref, a_sf_ref = _reference(x, params, stride=stride, padding=padding)
        quant_step = float(a_sf_ref[0])
        # Tolerances cover bf16 conv inputs (<~1% rel on the f32 reference),
        # one-quant-step rounding flips at tie points, and the induced scale
        # difference in the fake-quantized output.
        assert jnp.allclose(a_sf, a_sf_ref, rtol=2e-2, atol=1e-6), (a_sf, a_sf_ref)
        err = float(jnp.max(jnp.abs(y - y_ref)))
        assert err <= 4.0 * quant_step + 1e-4, (err, quant_step)

    print("KERNEL_OK")
</pallas_src>

<mosaic_0001>
module attributes {stable_mosaic.version = 11 : i64} {
  func.func @_conv_bias_relu_kernel(%arg0: i32, %arg1: i32, %arg2: memref<1x256x36xbf16, #tpu.memory_space<vmem>>, %arg3: memref<36x128xbf16, #tpu.memory_space<vmem>>, %arg4: memref<1x128xf32, #tpu.memory_space<vmem>>, %arg5: memref<1x256x128xf32, #tpu.memory_space<vmem>>, %arg6: memref<1x1x1x1xf32, #tpu.memory_space<vmem>>) attributes {dimension_semantics = [#tpu.dimension_semantics<parallel>, #tpu.dimension_semantics<parallel>], iteration_bounds = array<i64: 2, 1>, scalar_prefetch = 0 : i64, scratch_operands = 0 : i64, tpu.core_type = #tpu.core_type<tc>, window_params = [{transform_indices = @transform_0, window_bounds = array<i64: 1, 256, 36>}, {pipeline_mode = #tpu.pipeline_mode<synchronous>, transform_indices = @transform_1, window_bounds = array<i64: 36, 128>}, {pipeline_mode = #tpu.pipeline_mode<synchronous>, transform_indices = @transform_2, window_bounds = array<i64: 1, 128>}, {transform_indices = @transform_3, window_bounds = array<i64: 1, 256, 128>}, {transform_indices = @transform_4, window_bounds = array<i64: 1, 1, 1, 1>}]} {
    %c0 = arith.constant 0 : index
    %c0_0 = arith.constant 0 : index
    %c0_1 = arith.constant 0 : index
    %0 = vector.load %arg2[%c0, %c0_0, %c0_1] : memref<1x256x36xbf16, #tpu.memory_space<vmem>>, vector<1x256x36xbf16>
    %1 = vector.shape_cast %0 : vector<1x256x36xbf16> to vector<256x36xbf16>
    %c0_2 = arith.constant 0 : index
    %c0_3 = arith.constant 0 : index
    %2 = vector.load %arg3[%c0_2, %c0_3] : memref<36x128xbf16, #tpu.memory_space<vmem>>, vector<36x128xbf16>
    %cst = arith.constant dense<0.000000e+00> : vector<256x128xf32>
    %3 = tpu.matmul %1, %2, %cst {dimension_numbers = #tpu.dot_dimension_numbers<[1], [0], [0], [1], [0, 0, 1, 1], [], []>} : vector<256x36xbf16>, vector<36x128xbf16>, vector<256x128xf32> -> vector<256x128xf32>
    %c0_4 = arith.constant 0 : index
    %c0_5 = arith.constant 0 : index
    %4 = vector.load %arg4[%c0_4, %c0_5] : memref<1x128xf32, #tpu.memory_space<vmem>>, vector<1x128xf32>
    %5 = vector.broadcast %4 : vector<1x128xf32> to vector<256x128xf32>
    %6 = arith.addf %3, %5 : vector<256x128xf32>
    %cst_6 = arith.constant 0.000000e+00 : f32
    %7 = vector.broadcast %cst_6 : f32 to vector<256x128xf32>
    %8 = arith.maximumf %6, %7 : vector<256x128xf32>
    %c0_7 = arith.constant 0 : index
    %c0_8 = arith.constant 0 : index
    %c0_9 = arith.constant 0 : index
    %9 = vector.load %arg5[%c0_7, %c0_8, %c0_9] : memref<1x256x128xf32, #tpu.memory_space<vmem>>, vector<1x256x128xf32>
    %10 = vector.shape_cast %9 : vector<1x256x128xf32> to vector<256x128xf32>
    %11 = vector.shape_cast %8 : vector<256x128xf32> to vector<1x256x128xf32>
    tpu.vector_store %arg5[%c0_7, %c0_8, %c0_9], %11 {strides = array<i32>} : memref<1x256x128xf32, #tpu.memory_space<vmem>>, vector<1x256x128xf32>,
    %12 = vector.shape_cast %8 : vector<256x128xf32> to vector<1x256x128xf32>
    %cst_10 = arith.constant dense<0xFF800000> : vector<1xf32>
    %13 = vector.multi_reduction <maximumf>, %12, %cst_10 [1, 2] : vector<1x256x128xf32> to vector<1xf32>
    %14 = vector.shape_cast %13 : vector<1xf32> to vector<1x1x1xf32>
    %15 = vector.extract %14[0, 0, 0] : f32 from vector<1x1x1xf32>
    %16 = vector.broadcast %15 : f32 to vector<1x1x1x1xf32>
    %c0_11 = arith.constant 0 : index
    %c0_12 = arith.constant 0 : index
    %c0_13 = arith.constant 0 : index
    %c0_14 = arith.constant 0 : index
    %17 = vector.load %arg6[%c0_11, %c0_12, %c0_13, %c0_14] : memref<1x1x1x1xf32, #tpu.memory_space<vmem>>, vector<1x1x1x1xf32>
    tpu.vector_store %arg6[%c0_11, %c0_12, %c0_13, %c0_14], %16 {strides = array<i32>} : memref<1x1x1x1xf32, #tpu.memory_space<vmem>>, vector<1x1x1x1xf32>,
    return
  }
  func.func @transform_0(%arg0: i32, %arg1: i32) -> (i32, i32, i32) {
    %c0_i32 = arith.constant 0 : i32
    %c0_i32_0 = arith.constant 0 : i32
    return %arg0, %arg1, %c0_i32 : i32, i32, i32
  }
  func.func @transform_1(%arg0: i32, %arg1: i32) -> (i32, i32) {
    %c0_i32 = arith.constant 0 : i32
    %c0_i32_0 = arith.constant 0 : i32
    %c0_i32_1 = arith.constant 0 : i32
    return %c0_i32, %c0_i32_0 : i32, i32
  }
  func.func @transform_2(%arg0: i32, %arg1: i32) -> (i32, i32) {
    %c0_i32 = arith.constant 0 : i32
    %c0_i32_0 = arith.constant 0 : i32
    %c0_i32_1 = arith.constant 0 : i32
    return %c0_i32, %c0_i32_0 : i32, i32
  }
  func.func @transform_3(%arg0: i32, %arg1: i32) -> (i32, i32, i32) {
    %c0_i32 = arith.constant 0 : i32
    %c0_i32_0 = arith.constant 0 : i32
    return %arg0, %arg1, %c0_i32 : i32, i32, i32
  }
  func.func @transform_4(%arg0: i32, %arg1: i32) -> (i32, i32, i32, i32) {
    %c0_i32 = arith.constant 0 : i32
    %c0_i32_0 = arith.constant 0 : i32
    %c0_i32_1 = arith.constant 0 : i32
    return %arg0, %arg1, %c0_i32, %c0_i32_0 : i32, i32, i32, i32
  }
}

module attributes {stable_mosaic.version = 11 : i64} {
  func.func @_quant_act_kernel(%arg0: i32, %arg1: memref<1xf32, #tpu.memory_space<smem>>, %arg2: memref<512x128xf32, #tpu.memory_space<vmem>>, %arg3: memref<512x128xf32, #tpu.memory_space<vmem>>) attributes {dimension_semantics = [#tpu.dimension_semantics<parallel>], iteration_bounds = array<i64: 1>, scalar_prefetch = 0 : i64, scratch_operands = 0 : i64, tpu.core_type = #tpu.core_type<tc>, window_params = [{transform_indices = @transform_0, window_bounds = array<i64: 1>}, {transform_indices = @transform_1, window_bounds = array<i64: 512, 128>}, {transform_indices = @transform_2, window_bounds = array<i64: 512, 128>}]} {
    %c0 = arith.constant 0 : index
    %0 = memref.load %arg1[%c0] : memref<1xf32, #tpu.memory_space<smem>>
    %cst = arith.constant 1.000000e+00 : f32
    %1 = arith.divf %cst, %0 : f32
    %c0_0 = arith.constant 0 : index
    %c0_1 = arith.constant 0 : index
    %2 = vector.load %arg2[%c0_0, %c0_1] : memref<512x128xf32, #tpu.memory_space<vmem>>, vector<512x128xf32>
    %3 = vector.broadcast %1 : f32 to vector<512x128xf32>
    %4 = arith.mulf %2, %3 : vector<512x128xf32>
    %5 = math.roundeven %4 : vector<512x128xf32>
    %cst_2 = arith.constant -1.270000e+02 : f32
    %cst_3 = arith.constant 1.270000e+02 : f32
    %6 = vector.broadcast %cst_2 : f32 to vector<512x128xf32>
    %7 = arith.maximumf %6, %5 : vector<512x128xf32>
    %8 = vector.broadcast %cst_3 : f32 to vector<512x128xf32>
    %9 = arith.minimumf %8, %7 : vector<512x128xf32>
    %10 = vector.broadcast %0 : f32 to vector<512x128xf32>
    %11 = arith.mulf %9, %10 : vector<512x128xf32>
    %c0_4 = arith.constant 0 : index
    %c0_5 = arith.constant 0 : index
    %12 = vector.load %arg3[%c0_4, %c0_5] : memref<512x128xf32, #tpu.memory_space<vmem>>, vector<512x128xf32>
    tpu.vector_store %arg3[%c0_4, %c0_5], %11 {strides = array<i32>} : memref<512x128xf32, #tpu.memory_space<vmem>>, vector<512x128xf32>,
    return
  }
  func.func @transform_0(%arg0: i32) -> i32 {
    %c0_i32 = arith.constant 0 : i32
    %c0_i32_0 = arith.constant 0 : i32
    return %c0_i32 : i32
  }
  func.func @transform_1(%arg0: i32) -> (i32, i32) {
    %c0_i32 = arith.constant 0 : i32
    %c0_i32_0 = arith.constant 0 : i32
    return %arg0, %c0_i32 : i32, i32
  }
  func.func @transform_2(%arg0: i32) -> (i32, i32) {
    %c0_i32 = arith.constant 0 : i32
    %c0_i32_0 = arith.constant 0 : i32
    return %arg0, %c0_i32 : i32, i32
  }
}

</mosaic_0001>

<bundles_post_ra>
// kernel: q_incept_conv.3
= control target key start
LH: loop header
LB: loop body
LE: loop exit
PB: predicated region body
PF: predicated region fallthrough
CT: control target
= control target key end

     0   :  { %s3036_s0 = inlined_call_operand.<no memory space> [shape: f32[1], index: 0, kind: input, shape index: {}]   ;;  %s3037_s1 = inlined_call_operand.vmem [shape: f32[512,128], index: 1, kind: input, shape index: {}, may-alias: {1,2}]   ;;  %s3038_s2 = inlined_call_operand.vmem [shape: f32[512,128], index: 2, kind: output, shape index: {}, may-alias: {1,2}]  }
   0x1   :  { %v1068_v0 = vstv %s3036_s0  ;;  %v16_v2 = vld [vmem:[%s3037_s1] sm:$0xff]  ;;  %v17_v3 = vld [vmem:[%s3037_s1 + $0x8] sm:$0xff]  ;;  %v18_v4 = vld [vmem:[%s3037_s1 + $0x10] sm:$0xff] }
   0x2   :  { %3252 = vst [vmem:[#allocation3_spill] sm:$0xff] %v1068_v0  ;;  %1048 = vrcp.f32 %v1068_v0  ;;  %v19_v5 = vld [vmem:[%s3037_s1 + $0x18] sm:$0xff]  ;;  %v20_v6 = vld [vmem:[%s3037_s1 + $0x20] sm:$0xff]  ;;  %v21_v7 = vld [vmem:[%s3037_s1 + $0x28] sm:$0xff] }
   0x3   :  { %v22_v8 = vld [vmem:[%s3037_s1 + $0x30] sm:$0xff]  ;;  %v23_v9 = vld [vmem:[%s3037_s1 + $0x38] sm:$0xff]  ;;  %v24_v10 = vld [vmem:[%s3037_s1 + $0x40] sm:$0xff] }
   0x4   :  { %v25_v11 = vld [vmem:[%s3037_s1 + $0x48] sm:$0xff]  ;;  %v26_v12 = vld [vmem:[%s3037_s1 + $0x50] sm:$0xff]  ;;  %v27_v13 = vld [vmem:[%s3037_s1 + $0x58] sm:$0xff] }
   0x5   :  { %v28_v14 = vld [vmem:[%s3037_s1 + $0x60] sm:$0xff]  ;;  %v29_v15 = vld [vmem:[%s3037_s1 + $0x68] sm:$0xff]  ;;  %v30_v16 = vld [vmem:[%s3037_s1 + $0x70] sm:$0xff] }
   0x6   :  { %v31_v17 = vld [vmem:[%s3037_s1 + $0x78] sm:$0xff]  ;;  %v32_v18 = vld [vmem:[%s3037_s1 + $0x80] sm:$0xff]  ;;  %v33_v19 = vld [vmem:[%s3037_s1 + $0x88] sm:$0xff] }
   0x7   :  { %v34_v20 = vld [vmem:[%s3037_s1 + $0x90] sm:$0xff]  ;;  %v35_v21 = vld [vmem:[%s3037_s1 + $0x98] sm:$0xff]  ;;  %v36_v23 = vld [vmem:[%s3037_s1 + $0xa0] sm:$0xff] }
   0x8   :  { %v37_v24 = vld [vmem:[%s3037_s1 + $0xa8] sm:$0xff]  ;;  %v38_v25 = vld [vmem:[%s3037_s1 + $0xb0] sm:$0xff]  ;;  %v39_v26 = vld [vmem:[%s3037_s1 + $0xb8] sm:$0xff] }
   0x9   :  { %v40_v31 = vld [vmem:[%s3037_s1 + $0xc0] sm:$0xff]  ;;  %v41_v32 = vld [vmem:[%s3037_s1 + $0xc8] sm:$0xff]  ;;  %v42_v33 = vld [vmem:[%s3037_s1 + $0xd0] sm:$0xff] }
   0xa   :  { %v43_v34 = vld [vmem:[%s3037_s1 + $0xd8] sm:$0xff]  ;;  %v44_v39 = vld [vmem:[%s3037_s1 + $0xe0] sm:$0xff]  ;;  %v45_v40 = vld [vmem:[%s3037_s1 + $0xe8] sm:$0xff] }
   0xb   :  { %v46_v41 = vld [vmem:[%s3037_s1 + $0xf0] sm:$0xff]  ;;  %v47_v42 = vld [vmem:[%s3037_s1 + $0xf8] sm:$0xff]  ;;  %v48_v47 = vld [vmem:[%s3037_s1 + $0x100] sm:$0xff] }
   0xc   :  { %v49_v48 = vld [vmem:[%s3037_s1 + $0x108] sm:$0xff]  ;;  %v50_v49 = vld [vmem:[%s3037_s1 + $0x110] sm:$0xff]  ;;  %v51_v50 = vld [vmem:[%s3037_s1 + $0x118] sm:$0xff] }
   0xd   :  { %v52_v55 = vld [vmem:[%s3037_s1 + $0x120] sm:$0xff]  ;;  %v53_v56 = vld [vmem:[%s3037_s1 + $0x128] sm:$0xff]  ;;  %v54_v57 = vld [vmem:[%s3037_s1 + $0x130] sm:$0xff] }
   0xe   :  { %v55_v58 = vld [vmem:[%s3037_s1 + $0x138] sm:$0xff]  ;;  %v56_v63 = vld [vmem:[%s3037_s1 + $0x140] sm:$0xff]  ;;  %v74_v0 = vld [vmem:[%s3037_s1 + $0x1d0] sm:$0xff] }
   0xf   :  { %v1049_v1 = vpop.eup %1048 }
  0x10   :  { %534 = vpush %v1049_v1  ;;  %v57_v1 = vld [vmem:[%s3037_s1 + $0x148] sm:$0xff] }
  0x41   :  { %s535_s6 = spop %534 }
  0x42   :  { %v1131_v22 = vstv %s535_s6 }
  0x43   :  { %v1146_v27 = vmul.f32 %v1131_v22, %v16_v2  ;;  %v1149_v28 = vmul.f32 %v1131_v22, %v17_v3  ;;  %v1152_v29 = vmul.f32 %v1131_v22, %v18_v4  ;;  %v1155_v30 = vmul.f32 %v1131_v22, %v19_v5  ;;  %v58_v2 = vld [vmem:[%s3037_s1 + $0x150] sm:$0xff] }
  0x44   :  { %v1170_v35 = vmul.f32 %v1131_v22, %v20_v6  ;;  %v1173_v36 = vmul.f32 %v1131_v22, %v21_v7  ;;  %v1176_v37 = vmul.f32 %v1131_v22, %v22_v8  ;;  %v1179_v38 = vmul.f32 %v1131_v22, %v23_v9  ;;  %v59_v7 = vld [vmem:[%s3037_s1 + $0x158] sm:$0xff]  ;;  %v60_v8 = vld [vmem:[%s3037_s1 + $0x160] sm:$0xff]  ;;  %v61_v9 = vld [vmem:[%s3037_s1 + $0x168] sm:$0xff] }
  0x45   :  { %3253 = vst [vmem:[#allocation4_spill] sm:$0xff] %v1146_v27  ;;  %3254 = vst [vmem:[#allocation5_spill] sm:$0xff] %v1149_v28  ;;  %v1194_v43 = vmul.f32 %v1131_v22, %v24_v10  ;;  %v1197_v44 = vmul.f32 %v1131_v22, %v25_v11  ;;  %v1200_v45 = vmul.f32 %v1131_v22, %v26_v12 }
  0x46   :  { %3255 = vst [vmem:[#allocation6_spill] sm:$0xff] %v1152_v29  ;;  %3256 = vst [vmem:[#allocation7_spill] sm:$0xff] %v1155_v30  ;;  %v1203_v46 = vmul.f32 %v1131_v22, %v27_v13  ;;  %v1218_v51 = vmul.f32 %v1131_v22, %v28_v14  ;;  %v1221_v52 = vmul.f32 %v1131_v22, %v29_v15  ;;  %v62_v14 = vld [vmem:[%s3037_s1 + $0x170] sm:$0xff]  ;;  %v63_v15 = vld [vmem:[%s3037_s1 + $0x178] sm:$0xff] }
  0x47   :  { %3257 = vst [vmem:[#allocation8_spill] sm:$0xff] %v1170_v35  ;;  %3258 = vst [vmem:[#allocation9_spill] sm:$0xff] %v1176_v37  ;;  %v1224_v53 = vmul.f32 %v1131_v22, %v30_v16  ;;  %v1227_v54 = vmul.f32 %v1131_v22, %v31_v17  ;;  %v1242_v59 = vmul.f32 %v1131_v22, %v32_v18  ;;  %v64_v16 = vld [vmem:[%s3037_s1 + $0x180] sm:$0xff] }
  0x48   :  { %3259 = vst [vmem:[#allocation10_spill] sm:$0xff] %v1179_v38  ;;  %3260 = vst [vmem:[#allocation11_spill] sm:$0xff] %v1194_v43  ;;  %v1245_v60 = vmul.f32 %v1131_v22, %v33_v19  ;;  %v1248_v61 = vmul.f32 %v1131_v22, %v34_v20  ;;  %v1251_v62 = vmul.f32 %v1131_v22, %v35_v21  ;;  %v65_v21 = vld [vmem:[%s3037_s1 + $0x188] sm:$0xff] }
  0x49   :  { %3261 = vst [vmem:[#allocation12_spill] sm:$0xff] %v1197_v44  ;;  %3262 = vst [vmem:[#allocation13_spill] sm:$0xff] %v1203_v46  ;;  %v1263_v3 = vmul.f32 %v1131_v22, %v36_v23  ;;  %v1266_v4 = vmul.f32 %v1131_v22, %v37_v24  ;;  %v1269_v5 = vmul.f32 %v1131_v22, %v38_v25  ;;  %v66_v23 = vld [vmem:[%s3037_s1 + $0x190] sm:$0xff]  ;;  %v67_v24 = vld [vmem:[%s3037_s1 + $0x198] sm:$0xff] }
  0x4a   :  { %3263 = vst [vmem:[#allocation14_spill] sm:$0xff] %v1218_v51  ;;  %3264 = vst [vmem:[#allocation15_spill] sm:$0xff] %v1221_v52  ;;  %v1272_v6 = vmul.f32 %v1131_v22, %v39_v26  ;;  %v1284_v10 = vmul.f32 %v1131_v22, %v40_v31  ;;  %v1287_v11 = vmul.f32 %v1131_v22, %v41_v32 }
  0x4b   :  { %3265 = vst [vmem:[#allocation16_spill] sm:$0xff] %v1224_v53  ;;  %3266 = vst [vmem:[#allocation17_spill] sm:$0xff] %v1242_v59  ;;  %v1290_v12 = vmul.f32 %v1131_v22, %v42_v33  ;;  %v1293_v13 = vmul.f32 %v1131_v22, %v43_v34  ;;  %v1305_v17 = vmul.f32 %v1131_v22, %v44_v39  ;;  %v68_v33 = vld [vmem:[%s3037_s1 + $0x1a0] sm:$0xff]  ;;  %v69_v34 = vld [vmem:[%s3037_s1 + $0x1a8] sm:$0xff] }
  0x4c   :  { %3267 = vst [vmem:[#allocation18_spill] sm:$0xff] %v1245_v60  ;;  %3268 = vst [vmem:[#allocation19_spill] sm:$0xff] %v1248_v61  ;;  %v1308_v18 = vmul.f32 %v1131_v22, %v45_v40  ;;  %v1311_v19 = vmul.f32 %v1131_v22, %v46_v41  ;;  %v1314_v20 = vmul.f32 %v1131_v22, %v47_v42  ;;  %v70_v39 = vld [vmem:[%s3037_s1 + $0x1b0] sm:$0xff] }
  0x4d   :  { %3269 = vst [vmem:[#allocation20_spill] sm:$0xff] %v1251_v62  ;;  %3270 = vst [vmem:[#allocation21_spill] sm:$0xff] %v1266_v4  ;;  %v1326_v25 = vmul.f32 %v1131_v22, %v48_v47  ;;  %v1329_v26 = vmul.f32 %v1131_v22, %v49_v48  ;;  %v1332_v31 = vmul.f32 %v1131_v22, %v50_v49  ;;  %v71_v48 = vld [vmem:[%s3037_s1 + $0x1b8] sm:$0xff]  ;;  %v72_v49 = vld [vmem:[%s3037_s1 + $0x1c0] sm:$0xff] }
  0x4e   :  { %3271 = vst [vmem:[#allocation22_spill] sm:$0xff] %v1269_v5  ;;  %3272 = vst [vmem:[#allocation23_spill] sm:$0xff] %v1272_v6  ;;  %v1335_v32 = vmul.f32 %v1131_v22, %v51_v50  ;;  %v1347_v40 = vmul.f32 %v1131_v22, %v52_v55  ;;  %v1350_v41 = vmul.f32 %v1131_v22, %v53_v56  ;;  %v73_v50 = vld [vmem:[%s3037_s1 + $0x1c8] sm:$0xff] }
  0x4f   :  { %3273 = vst [vmem:[#allocation24_spill] sm:$0xff] %v1284_v10  ;;  %3274 = vst [vmem:[#allocation25_spill] sm:$0xff] %v1290_v12  ;;  %v1353_v42 = vmul.f32 %v1131_v22, %v54_v57  ;;  %v1356_v47 = vmul.f32 %v1131_v22, %v55_v58  ;;  %v1368_v55 = vmul.f32 %v1131_v22, %v56_v63  ;;  %v76_v63 = vld [vmem:[%s3037_s1 + $0x1e0] sm:$0xff] }
  0x50   :  { %3275 = vst [vmem:[#allocation26_spill] sm:$0xff] %v1293_v13  ;;  %3276 = vst [vmem:[#allocation27_spill] sm:$0xff] %v1305_v17  ;;  %v1371_v56 = vmul.f32 %v1131_v22, %v57_v1  ;;  %v1374_v57 = vmul.f32 %v1131_v22, %v58_v2  ;;  %v1377_v58 = vmul.f32 %v1131_v22, %v59_v7 }
  0x51   :  { %3277 = vst [vmem:[#allocation28_spill] sm:$0xff] %v1308_v18  ;;  %3278 = vst [vmem:[#allocation29_spill] sm:$0xff] %v1314_v20  ;;  %v1389_v1 = vmul.f32 %v1131_v22, %v60_v8  ;;  %v1392_v2 = vmul.f32 %v1131_v22, %v61_v9  ;;  %v1395_v7 = vmul.f32 %v1131_v22, %v62_v14  ;;  %v79_v8 = vld [vmem:[%s3037_s1 + $0x1f8] sm:$0xff] }
  0x52   :  { %3279 = vst [vmem:[#allocation30_spill] sm:$0xff] %v1326_v25  ;;  %3280 = vst [vmem:[#allocation31_spill] sm:$0xff] %v1329_v26  ;;  %v1410_v9 = vmul.f32 %v1131_v22, %v64_v16  ;;  %v1413_v14 = vmul.f32 %v1131_v22, %v65_v21  ;;  %v1431_v16 = vmul.f32 %v1131_v22, %v71_v48 }
  0x53   :  { %3281 = vst [vmem:[#allocation32_spill] sm:$0xff] %v1332_v31  ;;  %3282 = vst [vmem:[#allocation33_spill] sm:$0xff] %v1335_v32  ;;  %v1434_v21 = vmul.f32 %v1131_v22, %v72_v49  ;;  %v1455_v49 = vmul.f32 %v1131_v22, %v79_v8 }
  0x54   :  { %3283 = vst [vmem:[#allocation34_spill] sm:$0xff] %v1347_v40  ;;  %3284 = vst [vmem:[#allocation35_spill] sm:$0xff] %v1350_v41 }
  0x55   :  { %3285 = vst [vmem:[#allocation36_spill] sm:$0xff] %v1353_v42  ;;  %3286 = vst [vmem:[#allocation37_spill] sm:$0xff] %v1356_v47  ;;  %v75_v47 = vld [vmem:[%s3037_s1 + $0x1d8] sm:$0xff] }
  0x56   :  { %3287 = vst [vmem:[#allocation38_spill] sm:$0xff] %v1368_v55  ;;  %3288 = vst [vmem:[#allocation39_spill] sm:$0xff] %v1371_v56  ;;  %v78_v56 = vld [vmem:[%s3037_s1 + $0x1f0] sm:$0xff] }
  0x57   :  { %3289 = vst [vmem:[#allocation40_spill] sm:$0xff] %v1374_v57  ;;  %3290 = vst [vmem:[#allocation41_spill] sm:$0xff] %v1377_v58  ;;  %v1398_v58 = vmul.f32 %v1131_v22, %v63_v15  ;;  %v77_v57 = vld [vmem:[%s3037_s1 + $0x1e8] sm:$0xff]  ;;  %v1416_v15 = vmul.f32 %v1131_v22, %v66_v23  ;;  %v1437_v23 = vmul.f32 %v1131_v22, %v73_v50  ;;  %v536_v50 = vand.u32 2147483647, %v1146_v27 }
  0x58   :  { %3291 = vst [vmem:[#allocation42_spill] sm:$0xff] %v1389_v1  ;;  %3292 = vst [vmem:[#allocation43_spill] sm:$0xff] %v1392_v2  ;;  %v1425_v2 = vmul.f32 %v1131_v22, %v69_v34  ;;  %v1428_v1 = vmul.f32 %v1131_v22, %v70_v39  ;;  %v1446_v34 = vmul.f32 %v1131_v22, %v76_v63  ;;  %v546_v63 = vcvt.f32.s32 %v1149_v28 }
  0x59   :  { %3293 = vst [vmem:[#allocation44_spill] sm:$0xff] %v1395_v7  ;;  %3294 = vst [vmem:[#allocation45_spill] sm:$0xff] %v1398_v58  ;;  %v1419_v58 = vmul.f32 %v1131_v22, %v67_v24  ;;  %v1422_v7 = vmul.f32 %v1131_v22, %v68_v33  ;;  %v1440_v24 = vmul.f32 %v1131_v22, %v74_v0  ;;  %v538_v0 = vcvt.f32.s32 %v1146_v27 }
  0x5a   :  { %3295 = vst [vmem:[#allocation46_spill] sm:$0xff] %v1410_v9  ;;  %3296 = vst [vmem:[#allocation47_spill] sm:$0xff] %v1413_v14  ;;  %v1443_v33 = vmul.f32 %v1131_v22, %v75_v47  ;;  %v1449_v39 = vmul.f32 %v1131_v22, %v77_v57  ;;  %v1452_v48 = vmul.f32 %v1131_v22, %v78_v56  ;;  %v544_v47 = vand.u32 2147483647, %v1149_v28 }
  0x5b   :  { %3297 = vst [vmem:[#allocation48_spill] sm:$0xff] %v1416_v15  ;;  %3298 = vst [vmem:[#allocation49_spill] sm:$0xff] %v1419_v58  ;;  %v552_v57 = vand.u32 2147483647, %v1152_v29  ;;  %v554_v56 = vcvt.f32.s32 %v1152_v29  ;;  %vm1465_vm0 = vcmp.lt.f32.partialorder %v536_v50, 8388608.0  ;;  %v539_v22 = vcvt.s32.f32 %v538_v0 }
  0x5c   :  { %3299 = vst [vmem:[#allocation50_spill] sm:$0xff] %v1422_v7  ;;  %3300 = vst [vmem:[#allocation51_spill] sm:$0xff] %v1425_v2  ;;  %vm1469_vm1 = vcmp.lt.f32.partialorder %v544_v47, 8388608.0  ;;  %v562_v50 = vcvt.f32.s32 %v1155_v30  ;;  %v568_v0 = vand.u32 2147483647, %v1170_v35  ;;  %v3317_v7 = vmov 0 }
  0x5d   :  { %3301 = vst [vmem:[#allocation52_spill] sm:$0xff] %v1428_v1  ;;  %3302 = vst [vmem:[#allocation53_spill] sm:$0xff] %v1431_v16  ;;  %vm1474_vm2 = vcmp.lt.f32.partialorder %v552_v57, 8388608.0  ;;  %v540_v16 = vand.u32 2147483647, %v539_v22  ;;  %v565_v1 = vand.u32 2147483648, %v1155_v30 }
  0x5e   :  { %3303 = vst [vmem:[#allocation54_spill] sm:$0xff] %v1434_v21  ;;  %3304 = vst [vmem:[#allocation55_spill] sm:$0xff] %v1437_v23  ;;  %v555_v23 = vcvt.s32.f32 %v554_v56  ;;  %v560_v21 = vand.u32 2147483647, %v1155_v30  ;;  %v563_v56 = vcvt.s32.f32 %v562_v50  ;;  %vm1489_vm4 = vcmp.lt.f32.partialorder %v568_v0, 8388608.0 }
  0x5f   :  { %3305 = vst [vmem:[#allocation56_spill] sm:$0xff] %v1440_v24  ;;  %3306 = vst [vmem:[#allocation57_spill] sm:$0xff] %v1443_v33  ;;  %v541_v24 = vand.u32 2147483648, %v1146_v27  ;;  %v3320_v58 = vmov 0  ;;  %v573_v22 = vand.u32 2147483648, %v1170_v35  ;;  %v581_v50 = vand.u32 2147483648, %v1173_v36 }
  0x60   :  { %3307 = vst [vmem:[#allocation58_spill] sm:$0xff] %v1446_v34  ;;  %3308 = vst [vmem:[#allocation59_spill] sm:$0xff] %v1449_v39  ;;  %v549_v34 = vand.u32 2147483648, %v1149_v28  ;;  %v547_v39 = vcvt.s32.f32 %v546_v63  ;;  %v556_v2 = vand.u32 2147483647, %v555_v23  ;;  %vm1482_vm3 = vcmp.lt.f32.partialorder %v560_v21, 8388608.0 }
  0x61   :  { %3309 = vst [vmem:[#allocation60_spill] sm:$0xff] %v1452_v48  ;;  %3310 = vst [vmem:[#allocation61_spill] sm:$0xff] %v1455_v49  ;;  %v557_v49 = vand.u32 2147483648, %v1152_v29  ;;  %v3318_v7 = vsel %vm1482_vm3, 4294967295, %v3317_v7  ;;  %v570_v63 = vcvt.f32.s32 %v1170_v35  ;;  %v1487_v57 = vor.u32 %v541_v24, %v540_v16 }
  0x62   :  { %v548_v47 = vand.u32 2147483647, %v547_v39  ;;  %3319 = vst [vmem:[#allocation62_spill] sm:$0xff] %v3318_v7  ;;  %v3321_v58 = vsel %vm1489_vm4, 4294967295, %v3320_v58  ;;  %v576_v21 = vand.u32 2147483647, %v1173_v36  ;;  %v578_v39 = vcvt.f32.s32 %v1173_v36 }
  0x63   :  { %3322 = vst [vmem:[#allocation63_spill] sm:$0xff] %v3321_v58  ;;  %v1496_v14 = vor.u32 %v557_v49, %v556_v2  ;;  %v571_v23 = vcvt.s32.f32 %v570_v63  ;;  %v564_v24 = vand.u32 2147483647, %v563_v56  ;;  %v584_v56 = vand.u32 2147483647, %v1176_v37 }
  0x64   :  { %v1494_v15 = vor.u32 %v549_v34, %v548_v47  ;;  %vm1513_vm5 = vcmp.lt.f32.partialorder %v576_v21, 8388608.0  ;;  %v579_v63 = vcvt.s32.f32 %v578_v39  ;;  %v586_v16 = vcvt.f32.s32 %v1176_v37 }
  0x65   :  { %v572_v49 = vand.u32 2147483647, %v571_v23  ;;  %v1517_v47 = vor.u32 %v565_v1, %v564_v24  ;;  %v589_v34 = vand.u32 2147483648, %v1176_v37  ;;  %v592_v28 = vand.u32 2147483647, %v1179_v38 }
  0x66   :  { %v594_v2 = vcvt.f32.s32 %v1179_v38  ;;  %v580_v1 = vand.u32 2147483647, %v579_v63  ;;  %vm1530_vm6 = vcmp.lt.f32.partialorder %v584_v56, 8388608.0  ;;  %v3326_v21 = vmov 0 }
  0x67   :  { %v1521_v27 = vor.u32 %v573_v22, %v572_v49  ;;  %v3327_v21 = vsel %vm1530_vm6, 4294967295, %v3326_v21  ;;  %v587_v24 = vcvt.s32.f32 %v586_v16  ;;  %vm1538_vm7 = vcmp.lt.f32.partialorder %v592_v28, 8388608.0 }
  0x68   :  { %3328 = vst [vmem:[#allocation65_spill] sm:$0xff] %v3327_v21  ;;  %v595_v49 = vcvt.s32.f32 %v594_v2  ;;  %v597_v29 = vand.u32 2147483648, %v1179_v38  ;;  %v1543_v7 = vor.u32 %v581_v50, %v580_v1  ;;  %v600_v56 = vand.u32 2147483647, %v1194_v43 }
  0x69   :  { %3325 = vst [vmem:[#allocation64_spill] sm:$0xff] %v1521_v27  ;;  %v588_v63 = vand.u32 2147483647, %v587_v24  ;;  %v602_v23 = vcvt.f32.s32 %v1194_v43  ;;  %v605_v30 = vand.u32 2147483648, %v1194_v43  ;;  %v608_v58 = vand.u32 2147483647, %v1197_v44 }
  0x6a   :  { %v596_v16 = vand.u32 2147483647, %v595_v49  ;;  %v610_v28 = vcvt.f32.s32 %v1197_v44  ;;  %vm1556_vm8 = vcmp.lt.f32.partialorder %v600_v56, 8388608.0  ;;  %v3332_v50 = vmov 0 }
  0x6b   :  { %v1554_v22 = vor.u32 %v589_v34, %v588_v63  ;;  %v3333_v50 = vsel %vm1556_vm8, 4294967295, %v3332_v50  ;;  %v603_v1 = vcvt.s32.f32 %v602_v23  ;;  %vm1562_vm9 = vcmp.lt.f32.partialorder %v608_v58, 8388608.0 }
  0x6c   :  { %3334 = vst [vmem:[#allocation67_spill] sm:$0xff] %v3333_v50  ;;  %v1560_v24 = vor.u32 %v597_v29, %v596_v16  ;;  %v3336_v49 = vmov 0  ;;  %v611_v35 = vcvt.s32.f32 %v610_v28  ;;  %v613_v27 = vand.u32 2147483648, %v1197_v44 }
  0x6d   :  { %3331 = vst [vmem:[#allocation66_spill] sm:$0xff] %v1554_v22  ;;  %v3337_v49 = vsel %vm1562_vm9, 4294967295, %v3336_v49  ;;  %v604_v63 = vand.u32 2147483647, %v603_v1  ;;  %v616_v56 = vand.u32 2147483647, %v1200_v45  ;;  %v618_v2 = vcvt.f32.s32 %v1200_v45 }
  0x6e   :  { %3335 = vst [vmem:[#allocation68_spill] sm:$0xff] %v1560_v24  ;;  %3338 = vst [vmem:[#allocation69_spill] sm:$0xff] %v3337_v49  ;;  %v612_v58 = vand.u32 2147483647, %v611_v35  ;;  %v621_v23 = vand.u32 2147483648, %v1200_v45  ;;  %v3340_v21 = vmov 0  ;;  %v626_v34 = vcvt.f32.s32 %v1203_v46 }
  0x6f   :  { %v624_v16 = vand.u32 2147483647, %v1203_v46  ;;  %v1579_v28 = vor.u32 %v605_v30, %v604_v63  ;;  %vm1581_vm10 = vcmp.lt.f32.partialorder %v616_v56, 8388608.0  ;;  %v619_v1 = vcvt.s32.f32 %v618_v2 }
  0x70   :  { %v3341_v21 = vsel %vm1581_vm10, 4294967295, %v3340_v21  ;;  %v1586_v37 = vor.u32 %v613_v27, %v612_v58  ;;  %v3344_v22 = vmov 0  ;;  %v629_v35 = vand.u32 2147483648, %v1203_v46 }
  0x71   :  { %3339 = vst [vmem:[#allocation70_spill] sm:$0xff] %v1579_v28  ;;  %3342 = vst [vmem:[#allocation71_spill] sm:$0xff] %v3341_v21  ;;  %vm1588_vm11 = vcmp.lt.f32.partialorder %v624_v16, 8388608.0  ;;  %v632_v29 = vand.u32 2147483647, %v1218_v51  ;;  %v627_v56 = vcvt.s32.f32 %v626_v34  ;;  %v634_v2 = vcvt.f32.s32 %v1218_v51 }
  0x72   :  { %3343 = vst [vmem:[#allocation72_spill] sm:$0xff] %v1586_v37  ;;  %v3345_v22 = vsel %vm1588_vm11, 4294967295, %v3344_v22  ;;  %v620_v63 = vand.u32 2147483647, %v619_v1  ;;  %v3346_v58 = vmov 0  ;;  %v637_v16 = vand.u32 2147483648, %v1218_v51 }
  0x73   :  { %vm1603_vm12 = vcmp.lt.f32.partialorder %v632_v29, 8388608.0  ;;  %v640_v38 = vand.u32 2147483647, %v1221_v52  ;;  %v628_v30 = vand.u32 2147483647, %v627_v56  ;;  %v635_v1 = vcvt.s32.f32 %v634_v2 }
  0x74   :  { %v3347_v58 = vsel %vm1603_vm12, 4294967295, %v3346_v58  ;;  %v1609_v24 = vor.u32 %v621_v23, %v620_v63  ;;  %v642_v34 = vcvt.f32.s32 %v1221_v52  ;;  %v3348_v43 = vmov 0 }
  0x75   :  { %vm1612_vm13 = vcmp.lt.f32.partialorder %v640_v38, 8388608.0  ;;  %v645_v27 = vand.u32 2147483648, %v1221_v52  ;;  %v648_v29 = vand.u32 2147483647, %v1224_v53  ;;  %v650_v44 = vcvt.f32.s32 %v1224_v53  ;;  %v3568_v0 = vld [vmem:[#allocation68_spill] sm:$0xff] }
  0x76   :  { %v3349_v43 = vsel %vm1612_vm13, 4294967295, %v3348_v43  ;;  %v1623_v63 = vor.u32 %v629_v35, %v628_v30  ;;  %v636_v56 = vand.u32 2147483647, %v635_v1  ;;  %v643_v2 = vcvt.s32.f32 %v642_v34 }
  0x77   :  { %3350 = vst [vmem:[#allocation73_spill] sm:$0xff] %v3349_v43  ;;  %vm1625_vm14 = vcmp.lt.f32.partialorder %v648_v29, 8388608.0  ;;  %v3351_v38 = vmov 0  ;;  %v651_v37 = vcvt.s32.f32 %v650_v44  ;;  %v653_v49 = vand.u32 2147483648, %v1224_v53 }
  0x78   :  { %v3352_v38 = vsel %vm1625_vm14, 4294967295, %v3351_v38  ;;  %v656_v28 = vand.u32 2147483647, %v1227_v54  ;;  %v1635_v21 = vor.u32 %v637_v16, %v636_v56  ;;  %v644_v35 = vand.u32 2147483647, %v643_v2 }
  0x79   :  { %3353 = vst [vmem:[#allocation74_spill] sm:$0xff] %v3352_v38  ;;  %v658_v30 = vcvt.f32.s32 %v1227_v54  ;;  %v652_v1 = vand.u32 2147483647, %v651_v37  ;;  %v3355_v34 = vmov 0  ;;  %v661_v44 = vand.u32 2147483648, %v1227_v54 }
  0x7a   :  { %3354 = vst [vmem:[#allocation75_spill] sm:$0xff] %v1635_v21  ;;  %vm1638_vm15 = vcmp.lt.f32.partialorder %v656_v28, 8388608.0  ;;  %v664_v29 = vand.u32 2147483647, %v1242_v59  ;;  %v1648_v50 = vor.u32 %v645_v27, %v644_v35  ;;  %v666_v56 = vcvt.f32.s32 %v1242_v59 }
  0x7b   :  { %v3356_v34 = vsel %vm1638_vm15, 4294967295, %v3355_v34  ;;  %v659_v16 = vcvt.s32.f32 %v658_v30  ;;  %v1651_v2 = vor.u32 %v653_v49, %v652_v1  ;;  %v3360_v37 = vmov 0 }
  0x7c   :  { %3357 = vst [vmem:[#allocation76_spill] sm:$0xff] %v3356_v34  ;;  %3358 = vst [vmem:[#allocation77_spill] sm:$0xff] %v1648_v50  ;;  %vm1653_vm11 = vcmp.lt.f32.partialorder %v664_v29, 8388608.0  ;;  %v669_v28 = vand.u32 2147483648, %v1242_v59  ;;  %v672_v46 = vand.u32 2147483647, %v1245_v60  ;;  %v667_v35 = vcvt.s32.f32 %v666_v56 }
  0x7d   :  { %3359 = vst [vmem:[#allocation78_spill] sm:$0xff] %v1651_v2  ;;  %v3361_v37 = vsel %vm1653_vm11, 4294967295, %v3360_v37  ;;  %v660_v27 = vand.u32 2147483647, %v659_v16  ;;  %v674_v30 = vcvt.f32.s32 %v1245_v60  ;;  %v3362_v1 = vmov 0 }
  0x7e   :  { %vm1668_vm12 = vcmp.lt.f32.partialorder %v672_v46, 8388608.0  ;;  %v677_v29 = vand.u32 2147483648, %v1245_v60  ;;  %v680_v51 = vand.u32 2147483647, %v1248_v61  ;;  %v668_v23 = vand.u32 2147483647, %v667_v35 }
  0x7f   :  { %v3363_v1 = vsel %vm1668_vm12, 4294967295, %v3362_v1  ;;  %v1674_v21 = vor.u32 %v661_v44, %v660_v27  ;;  %v675_v16 = vcvt.s32.f32 %v674_v30  ;;  %v682_v56 = vcvt.f32.s32 %v1248_v61 }
  0x80   :  { %vm1677_vm13 = vcmp.lt.f32.partialorder %v680_v51, 8388608.0  ;;  %v3364_v52 = vmov 0  ;;  %v685_v49 = vand.u32 2147483648, %v1248_v61  ;;  %v688_v46 = vand.u32 2147483647, %v1251_v62 }
  0x81   :  { %v3365_v52 = vsel %vm1677_vm13, 4294967295, %v3364_v52  ;;  %v690_v53 = vcvt.f32.s32 %v1251_v62  ;;  %v1688_v27 = vor.u32 %v669_v28, %v668_v23  ;;  %v676_v35 = vand.u32 2147483647, %v675_v16 }
  0x82   :  { %3366 = vst [vmem:[#allocation79_spill] sm:$0xff] %v3365_v52  ;;  %v683_v30 = vcvt.s32.f32 %v682_v56  ;;  %vm1690_vm14 = vcmp.lt.f32.partialorder %v688_v46, 8388608.0  ;;  %v3367_v51 = vmov 0  ;;  %v693_v38 = vand.u32 2147483648, %v1251_v62 }
  0x83   :  { %v3368_v51 = vsel %vm1690_vm14, 4294967295, %v3367_v51  ;;  %v691_v2 = vcvt.s32.f32 %v690_v53  ;;  %v696_v50 = vand.u32 2147483647, %v1263_v3  ;;  %v1700_v34 = vor.u32 %v677_v29, %v676_v35 }
  0x84   :  { %3369 = vst [vmem:[#allocation80_spill] sm:$0xff] %v3368_v51  ;;  %v684_v23 = vand.u32 2147483647, %v683_v30  ;;  %v698_v28 = vcvt.f32.s32 %v1263_v3  ;;  %v3371_v56 = vmov 0  ;;  %v701_v53 = vand.u32 2147483648, %v1263_v3 }
  0x85   :  { %3370 = vst [vmem:[#allocation81_spill] sm:$0xff] %v1700_v34  ;;  %v692_v16 = vand.u32 2147483647, %v691_v2  ;;  %vm1703_vm15 = vcmp.lt.f32.partialorder %v696_v50, 8388608.0  ;;  %v704_v46 = vand.u32 2147483647, %v1266_v4  ;;  %v706_v35 = vcvt.f32.s32 %v1266_v4 }
  0x86   :  { %v3372_v56 = vsel %vm1703_vm15, 4294967295, %v3371_v56  ;;  %v1713_v43 = vor.u32 %v685_v49, %v684_v23  ;;  %v699_v29 = vcvt.s32.f32 %v698_v28  ;;  %v3376_v50 = vmov 0 }
  0x87   :  { %3373 = vst [vmem:[#allocation82_spill] sm:$0xff] %v3372_v56  ;;  %v1716_v30 = vor.u32 %v693_v38, %v692_v16  ;;  %vm1718_vm11 = vcmp.lt.f32.partialorder %v704_v46, 8388608.0  ;;  %v709_v2 = vand.u32 2147483648, %v1266_v4  ;;  %v712_v59 = vand.u32 2147483647, %v1269_v5 }
  0x88   :  { %3374 = vst [vmem:[#allocation83_spill] sm:$0xff] %v1713_v43  ;;  %v3377_v50 = vsel %vm1718_vm11, 4294967295, %v3376_v50  ;;  %v700_v49 = vand.u32 2147483647, %v699_v29  ;;  %v707_v23 = vcvt.s32.f32 %v706_v35  ;;  %v714_v28 = vcvt.f32.s32 %v1269_v5 }
  0x89   :  { %3375 = vst [vmem:[#allocation84_spill] sm:$0xff] %v1716_v30  ;;  %vm1733_vm12 = vcmp.lt.f32.partialorder %v712_v59, 8388608.0  ;;  %v3378_v16 = vmov 0  ;;  %v717_v46 = vand.u32 2147483648, %v1269_v5  ;;  %v720_v60 = vand.u32 2147483647, %v1272_v6 }
  0x8a   :  { %v3379_v16 = vsel %vm1733_vm12, 4294967295, %v3378_v16  ;;  %v1739_v34 = vor.u32 %v701_v53, %v700_v49  ;;  %v708_v44 = vand.u32 2147483647, %v707_v23  ;;  %v715_v29 = vcvt.s32.f32 %v714_v28 }
  0x8b   :  { %v722_v35 = vcvt.f32.s32 %v1272_v6  ;;  %vm1742_vm13 = vcmp.lt.f32.partialorder %v720_v60, 8388608.0  ;;  %v3380_v61 = vmov 0  ;;  %v725_v38 = vand.u32 2147483648, %v1272_v6 }
  0x8c   :  { %v3381_v61 = vsel %vm1742_vm13, 4294967295, %v3380_v61  ;;  %v728_v59 = vand.u32 2147483647, %v1284_v10  ;;  %v730_v62 = vcvt.f32.s32 %v1284_v10  ;;  %v1753_v49 = vor.u32 %v709_v2, %v708_v44 }
  0x8d   :  { %3382 = vst [vmem:[#allocation85_spill] sm:$0xff] %v3381_v61  ;;  %v716_v23 = vand.u32 2147483647, %v715_v29  ;;  %v723_v28 = vcvt.s32.f32 %v722_v35  ;;  %v3383_v60 = vmov 0  ;;  %v733_v51 = vand.u32 2147483648, %v1284_v10 }
  0x8e   :  { %vm1755_vm14 = vcmp.lt.f32.partialorder %v728_v59, 8388608.0  ;;  %v731_v30 = vcvt.s32.f32 %v730_v62  ;;  %v736_v43 = vand.u32 2147483647, %v1287_v11  ;;  %v738_v2 = vcvt.f32.s32 %v1287_v11 }
  0x8f   :  { %v3384_v60 = vsel %vm1755_vm14, 4294967295, %v3383_v60  ;;  %v1765_v56 = vor.u32 %v717_v46, %v716_v23  ;;  %v724_v44 = vand.u32 2147483647, %v723_v28  ;;  %v3387_v35 = vmov 0 }
  0x90   :  { %3385 = vst [vmem:[#allocation86_spill] sm:$0xff] %v3384_v60  ;;  %v732_v29 = vand.u32 2147483647, %v731_v30  ;;  %vm1768_vm15 = vcmp.lt.f32.partialorder %v736_v43, 8388608.0  ;;  %v741_v62 = vand.u32 2147483648, %v1287_v11  ;;  %v739_v46 = vcvt.s32.f32 %v738_v2 }
  0x91   :  { %3386 = vst [vmem:[#allocation87_spill] sm:$0xff] %v1765_v56  ;;  %v3388_v35 = vsel %vm1768_vm15, 4294967295, %v3387_v35  ;;  %v744_v59 = vand.u32 2147483647, %v1290_v12  ;;  %v1778_v52 = vor.u32 %v725_v38, %v724_v44  ;;  %v746_v23 = vcvt.f32.s32 %v1290_v12 }
  0x92   :  { %3389 = vst [vmem:[#allocation88_spill] sm:$0xff] %v3388_v35  ;;  %v1781_v28 = vor.u32 %v733_v51, %v732_v29  ;;  %v3392_v43 = vmov 0  ;;  %v749_v30 = vand.u32 2147483648, %v1290_v12  ;;  %v752_v4 = vand.u32 2147483647, %v1293_v13 }
  0x93   :  { %3390 = vst [vmem:[#allocation89_spill] sm:$0xff] %v1778_v52  ;;  %vm1783_vm11 = vcmp.lt.f32.partialorder %v744_v59, 8388608.0  ;;  %v740_v38 = vand.u32 2147483647, %v739_v46  ;;  %v747_v44 = vcvt.s32.f32 %v746_v23  ;;  %v754_v2 = vcvt.f32.s32 %v1293_v13 }
  0x94   :  { %3391 = vst [vmem:[#allocation90_spill] sm:$0xff] %v1781_v28  ;;  %v3393_v43 = vsel %vm1783_vm11, 4294967295, %v3392_v43  ;;  %vm1798_vm12 = vcmp.lt.f32.partialorder %v752_v4, 8388608.0  ;;  %v3394_v29 = vmov 0  ;;  %v757_v59 = vand.u32 2147483648, %v1293_v13 }
  0x95   :  { %v3395_v29 = vsel %vm1798_vm12, 4294967295, %v3394_v29  ;;  %v760_v5 = vand.u32 2147483647, %v1305_v17  ;;  %v1804_v56 = vor.u32 %v741_v62, %v740_v38  ;;  %v748_v53 = vand.u32 2147483647, %v747_v44 }
  0x96   :  { %v755_v46 = vcvt.s32.f32 %v754_v2  ;;  %v762_v23 = vcvt.f32.s32 %v1305_v17  ;;  %v3396_v6 = vmov 0  ;;  %v765_v51 = vand.u32 2147483648, %v1305_v17 }
  0x97   :  { %vm1807_vm13 = vcmp.lt.f32.partialorder %v760_v5, 8388608.0  ;;  %v768_v4 = vand.u32 2147483647, %v1308_v18  ;;  %v770_v10 = vcvt.f32.s32 %v1308_v18  ;;  %v1818_v38 = vor.u32 %v749_v30, %v748_v53 }
  0x98   :  { %v3397_v6 = vsel %vm1807_vm13, 4294967295, %v3396_v6  ;;  %v756_v44 = vand.u32 2147483647, %v755_v46  ;;  %v763_v2 = vcvt.s32.f32 %v762_v23  ;;  %v3399_v5 = vmov 0 }
  0x99   :  { %3398 = vst [vmem:[#allocation91_spill] sm:$0xff] %v3397_v6  ;;  %vm1820_vm14 = vcmp.lt.f32.partialorder %v768_v4, 8388608.0  ;;  %v771_v28 = vcvt.s32.f32 %v770_v10  ;;  %v773_v60 = vand.u32 2147483648, %v1308_v18  ;;  %v776_v52 = vand.u32 2147483647, %v1311_v19 }
  0x9a   :  { %v3400_v5 = vsel %vm1820_vm14, 4294967295, %v3399_v5  ;;  %v1830_v35 = vor.u32 %v757_v59, %v756_v44  ;;  %v764_v53 = vand.u32 2147483647, %v763_v2  ;;  %v778_v30 = vcvt.f32.s32 %v1311_v19 }
  0x9b   :  { %3401 = vst [vmem:[#allocation92_spill] sm:$0xff] %v3400_v5  ;;  %v772_v46 = vand.u32 2147483647, %v771_v28  ;;  %vm1833_vm15 = vcmp.lt.f32.partialorder %v776_v52, 8388608.0  ;;  %v3403_v23 = vmov 0  ;;  %v781_v10 = vand.u32 2147483648, %v1311_v19 }
  0x9c   :  { %3402 = vst [vmem:[#allocation93_spill] sm:$0xff] %v1830_v35  ;;  %v3404_v23 = vsel %vm1833_vm15, 4294967295, %v3403_v23  ;;  %v784_v4 = vand.u32 2147483647, %v1314_v20  ;;  %v1843_v61 = vor.u32 %v765_v51, %v764_v53  ;;  %v779_v59 = vcvt.s32.f32 %v778_v30 }
  0x9d   :  { %3405 = vst [vmem:[#allocation94_spill] sm:$0xff] %v3404_v23  ;;  %v786_v44 = vcvt.f32.s32 %v1314_v20  ;;  %v1846_v2 = vor.u32 %v773_v60, %v772_v46  ;;  %v3408_v52 = vmov 0  ;;  %v789_v28 = vand.u32 2147483648, %v1314_v20 }
  0x9e   :  { %3406 = vst [vmem:[#allocation95_spill] sm:$0xff] %v1843_v61  ;;  %vm1848_vm11 = vcmp.lt.f32.partialorder %v784_v4, 8388608.0  ;;  %v792_v12 = vand.u32 2147483647, %v1326_v25  ;;  %v780_v51 = vand.u32 2147483647, %v779_v59  ;;  %v794_v30 = vcvt.f32.s32 %v1326_v25 }
  0x9f   :  { %3407 = vst [vmem:[#allocation96_spill] sm:$0xff] %v1846_v2  ;;  %v3409_v52 = vsel %vm1848_vm11, 4294967295, %v3408_v52  ;;  %v787_v53 = vcvt.s32.f32 %v786_v44  ;;  %v3410_v46 = vmov 0  ;;  %v797_v4 = vand.u32 2147483648, %v1326_v25 }
  0xa0   :  { %vm1863_vm12 = vcmp.lt.f32.partialorder %v792_v12, 8388608.0  ;;  %v800_v13 = vand.u32 2147483647, %v1329_v26  ;;  %v1869_v35 = vor.u32 %v781_v10, %v780_v51  ;;  %v795_v59 = vcvt.s32.f32 %v794_v30 }
  0xa1   :  { %v3411_v46 = vsel %vm1863_vm12, 4294967295, %v3410_v46  ;;  %v788_v62 = vand.u32 2147483647, %v787_v53  ;;  %v802_v44 = vcvt.f32.s32 %v1329_v26  ;;  %v3413_v17 = vmov 0 }
  0xa2   :  { %3412 = vst [vmem:[#allocation97_spill] sm:$0xff] %v3411_v46  ;;  %vm1872_vm13 = vcmp.lt.f32.partialorder %v800_v13, 8388608.0  ;;  %v805_v60 = vand.u32 2147483648, %v1329_v26  ;;  %v808_v12 = vand.u32 2147483647, %v1332_v31  ;;  %v810_v18 = vcvt.f32.s32 %v1332_v31 }
  0xa3   :  { %v3414_v17 = vsel %vm1872_vm13, 4294967295, %v3413_v17  ;;  %v1883_v51 = vor.u32 %v789_v28, %v788_v62  ;;  %v796_v53 = vand.u32 2147483647, %v795_v59  ;;  %v803_v30 = vcvt.s32.f32 %v802_v44 }
  0xa4   :  { %3415 = vst [vmem:[#allocation98_spill] sm:$0xff] %v3414_v17  ;;  %vm1885_vm14 = vcmp.lt.f32.partialorder %v808_v12, 8388608.0  ;;  %v3416_v13 = vmov 0  ;;  %v811_v2 = vcvt.s32.f32 %v810_v18  ;;  %v813_v5 = vand.u32 2147483648, %v1332_v31 }
  0xa5   :  { %v3417_v13 = vsel %vm1885_vm14, 4294967295, %v3416_v13  ;;  %v816_v61 = vand.u32 2147483647, %v1335_v32  ;;  %v1895_v23 = vor.u32 %v797_v4, %v796_v53  ;;  %v804_v62 = vand.u32 2147483647, %v803_v30 }
  0xa6   :  { %3418 = vst [vmem:[#allocation99_spill] sm:$0xff] %v3417_v13  ;;  %v818_v28 = vcvt.f32.s32 %v1335_v32  ;;  %v812_v59 = vand.u32 2147483647, %v811_v2  ;;  %v3420_v44 = vmov 0  ;;  %v821_v18 = vand.u32 2147483648, %v1335_v32 }
  0xa7   :  { %3419 = vst [vmem:[#allocation100_spill] sm:$0xff] %v1895_v23  ;;  %vm1898_vm15 = vcmp.lt.f32.partialorder %v816_v61, 8388608.0  ;;  %v824_v12 = vand.u32 2147483647, %v1347_v40  ;;  %v1908_v6 = vor.u32 %v805_v60, %v804_v62  ;;  %v826_v53 = vcvt.f32.s32 %v1347_v40 }
  0xa8   :  { %v3421_v44 = vsel %vm1898_vm15, 4294967295, %v3420_v44  ;;  %v819_v4 = vcvt.s32.f32 %v818_v28  ;;  %v1911_v30 = vor.u32 %v813_v5, %v812_v59  ;;  %v3425_v61 = vmov 0 }
  0xa9   :  { %3422 = vst [vmem:[#allocation101_spill] sm:$0xff] %v3421_v44  ;;  %3423 = vst [vmem:[#allocation102_spill] sm:$0xff] %v1908_v6  ;;  %vm1913_vm11 = vcmp.lt.f32.partialorder %v824_v12, 8388608.0  ;;  %v829_v2 = vand.u32 2147483648, %v1347_v40  ;;  %v832_v20 = vand.u32 2147483647, %v1350_v41  ;;  %v827_v62 = vcvt.s32.f32 %v826_v53 }
  0xaa   :  { %3424 = vst [vmem:[#allocation103_spill] sm:$0xff] %v1911_v30  ;;  %v3426_v61 = vsel %vm1913_vm11, 4294967295, %v3425_v61  ;;  %v820_v60 = vand.u32 2147483647, %v819_v4  ;;  %v834_v28 = vcvt.f32.s32 %v1350_v41  ;;  %v3428_v59 = vmov 0  ;;  %v3450_v40 = vld [vmem:[#allocation40_spill] sm:$0xff] }
  0xab   :  { %3427 = vst [vmem:[#allocation104_spill] sm:$0xff] %v3426_v61  ;;  %vm1928_vm12 = vcmp.lt.f32.partialorder %v832_v20, 8388608.0  ;;  %v837_v12 = vand.u32 2147483648, %v1350_v41  ;;  %v840_v25 = vand.u32 2147483647, %v1353_v42  ;;  %v842_v53 = vcvt.f32.s32 %v1353_v42  ;;  %v3435_v20 = vld [vmem:[#allocation37_spill] sm:$0xff] }
  0xac   :  { %v3429_v59 = vsel %vm1928_vm12, 4294967295, %v3428_v59  ;;  %v1934_v23 = vor.u32 %v821_v18, %v820_v60  ;;  %v828_v10 = vand.u32 2147483647, %v827_v62  ;;  %v835_v4 = vcvt.s32.f32 %v834_v28  ;;  %v3454_v41 = vld [vmem:[#allocation41_spill] sm:$0xff] }
  0xad   :  { %3430 = vst [vmem:[#allocation105_spill] sm:$0xff] %v3429_v59  ;;  %vm1937_vm13 = vcmp.lt.f32.partialorder %v840_v25, 8388608.0  ;;  %v3432_v26 = vmov 0  ;;  %v845_v5 = vand.u32 2147483648, %v1353_v42  ;;  %v848_v31 = vand.u32 2147483647, %v3435_v20 }
  0xae   :  { %3431 = vst [vmem:[#allocation106_spill] sm:$0xff] %v1934_v23  ;;  %v3433_v26 = vsel %vm1937_vm13, 4294967295, %v3432_v26  ;;  %v850_v30 = vcvt.f32.s32 %v3435_v20  ;;  %v1948_v60 = vor.u32 %v829_v2, %v828_v10  ;;  %v836_v62 = vand.u32 2147483647, %v835_v4 }
  0xaf   :  { %3434 = vst [vmem:[#allocation107_spill] sm:$0xff] %v3433_v26  ;;  %v843_v28 = vcvt.s32.f32 %v842_v53  ;;  %vm1950_vm14 = vcmp.lt.f32.partialorder %v848_v31, 8388608.0  ;;  %v3437_v25 = vmov 0  ;;  %v853_v6 = vand.u32 2147483648, %v3435_v20  ;;  %v3444_v53 = vld [vmem:[#allocation39_spill] sm:$0xff] }
  0xb0   :  { %3436 = vst [vmem:[#allocation108_spill] sm:$0xff] %v1948_v60  ;;  %v3438_v25 = vsel %vm1950_vm14, 4294967295, %v3437_v25  ;;  %v851_v13 = vcvt.s32.f32 %v850_v30  ;;  %v856_v17 = vand.u32 2147483647, %v1368_v55  ;;  %v1960_v44 = vor.u32 %v837_v12, %v836_v62  ;;  %v3463_v26 = vld [vmem:[#allocation43_spill] sm:$0xff] }
  0xb1   :  { %3439 = vst [vmem:[#allocation109_spill] sm:$0xff] %v3438_v25  ;;  %v844_v10 = vand.u32 2147483647, %v843_v28  ;;  %v858_v2 = vcvt.f32.s32 %v1368_v55  ;;  %v3441_v31 = vmov 0  ;;  %v861_v30 = vand.u32 2147483648, %v1368_v55 }
  0xb2   :  { %3440 = vst [vmem:[#allocation110_spill] sm:$0xff] %v1960_v44  ;;  %v852_v4 = vand.u32 2147483647, %v851_v13  ;;  %vm1963_vm15 = vcmp.lt.f32.partialorder %v856_v17, 8388608.0  ;;  %v864_v18 = vand.u32 2147483647, %v3444_v53  ;;  %v866_v62 = vcvt.f32.s32 %v3444_v53 }
  0xb3   :  { %v3442_v31 = vsel %vm1963_vm15, 4294967295, %v3441_v31  ;;  %v1973_v46 = vor.u32 %v845_v5, %v844_v10  ;;  %v859_v12 = vcvt.s32.f32 %v858_v2  ;;  %v3447_v17 = vmov 0 }
  0xb4   :  { %3443 = vst [vmem:[#allocation111_spill] sm:$0xff] %v3442_v31  ;;  %v1976_v28 = vor.u32 %v853_v6, %v852_v4  ;;  %vm1978_vm11 = vcmp.lt.f32.partialorder %v864_v18, 8388608.0  ;;  %v869_v13 = vand.u32 2147483648, %v3444_v53  ;;  %v872_v60 = vand.u32 2147483647, %v3450_v40  ;;  %v3474_v53 = vld [vmem:[#allocation45_spill] sm:$0xff] }
  0xb5   :  { %3445 = vst [vmem:[#allocation112_spill] sm:$0xff] %v1973_v46  ;;  %v3448_v17 = vsel %vm1978_vm11, 4294967295, %v3447_v17  ;;  %v860_v5 = vand.u32 2147483647, %v859_v12  ;;  %v867_v10 = vcvt.s32.f32 %v866_v62  ;;  %v874_v2 = vcvt.f32.s32 %v3450_v40 }
  0xb6   :  { %3446 = vst [vmem:[#allocation113_spill] sm:$0xff] %v1976_v28  ;;  %3449 = vst [vmem:[#allocation114_spill] sm:$0xff] %v3448_v17  ;;  %vm1993_vm12 = vcmp.lt.f32.partialorder %v872_v60, 8388608.0  ;;  %v3451_v18 = vmov 0  ;;  %v877_v4 = vand.u32 2147483648, %v3450_v40  ;;  %v882_v62 = vcvt.f32.s32 %v3454_v41  ;;  %v3458_v60 = vld [vmem:[#allocation42_spill] sm:$0xff] }
  0xb7   :  { %v3452_v18 = vsel %vm1993_vm12, 4294967295, %v3451_v18  ;;  %v880_v44 = vand.u32 2147483647, %v3454_v41  ;;  %v1999_v59 = vor.u32 %v861_v30, %v860_v5  ;;  %v868_v61 = vand.u32 2147483647, %v867_v10 }
  0xb8   :  { %3453 = vst [vmem:[#allocation115_spill] sm:$0xff] %v3452_v18  ;;  %v875_v12 = vcvt.s32.f32 %v874_v2  ;;  %v3455_v42 = vmov 0  ;;  %v885_v6 = vand.u32 2147483648, %v3454_v41  ;;  %v888_v20 = vand.u32 2147483647, %v3458_v60 }
  0xb9   :  { %vm2002_vm13 = vcmp.lt.f32.partialorder %v880_v44, 8388608.0  ;;  %v890_v28 = vcvt.f32.s32 %v3458_v60  ;;  %v2013_v5 = vor.u32 %v869_v13, %v868_v61  ;;  %v883_v2 = vcvt.s32.f32 %v882_v62  ;;  %v3468_v62 = vld [vmem:[#allocation44_spill] sm:$0xff] }
  0xba   :  { %v3456_v42 = vsel %vm2002_vm13, 4294967295, %v3455_v42  ;;  %v876_v10 = vand.u32 2147483647, %v875_v12  ;;  %vm2015_vm14 = vcmp.lt.f32.partialorder %v888_v20, 8388608.0  ;;  %v3460_v44 = vmov 0 }
  0xbb   :  { %3457 = vst [vmem:[#allocation116_spill] sm:$0xff] %v3456_v42  ;;  %3459 = vst [vmem:[#allocation117_spill] sm:$0xff] %v2013_v5  ;;  %v3461_v44 = vsel %vm2015_vm14, 4294967295, %v3460_v44  ;;  %v891_v25 = vcvt.s32.f32 %v890_v28  ;;  %v893_v46 = vand.u32 2147483648, %v3458_v60  ;;  %v896_v32 = vand.u32 2147483647, %v3463_v26 }
  0xbc   :  { %3462 = vst [vmem:[#allocation118_spill] sm:$0xff] %v3461_v44  ;;  %v2025_v31 = vor.u32 %v877_v4, %v876_v10  ;;  %v884_v61 = vand.u32 2147483647, %v883_v2  ;;  %v898_v13 = vcvt.f32.s32 %v3463_v26  ;;  %v3465_v20 = vmov 0  ;;  %v3487_v42 = vld [vmem:[#allocation48_spill] sm:$0xff] }
  0xbd   :  { %v892_v12 = vand.u32 2147483647, %v891_v25  ;;  %vm2028_vm15 = vcmp.lt.f32.partialorder %v896_v32, 8388608.0  ;;  %v901_v28 = vand.u32 2147483648, %v3463_v26  ;;  %v904_v30 = vand.u32 2147483647, %v3468_v62 }
  0xbe   :  { %3464 = vst [vmem:[#allocation119_spill] sm:$0xff] %v2025_v31  ;;  %v3466_v20 = vsel %vm2028_vm15, 4294967295, %v3465_v20  ;;  %v2038_v23 = vor.u32 %v885_v6, %v884_v61  ;;  %v899_v4 = vcvt.s32.f32 %v898_v13  ;;  %v906_v10 = vcvt.f32.s32 %v3468_v62 }
  0xbf   :  { %3467 = vst [vmem:[#allocation120_spill] sm:$0xff] %v3466_v20  ;;  %v2041_v2 = vor.u32 %v893_v46, %v892_v12  ;;  %vm2043_vm11 = vcmp.lt.f32.partialorder %v904_v30, 8388608.0  ;;  %v3471_v32 = vmov 0  ;;  %v909_v25 = vand.u32 2147483648, %v3468_v62  ;;  %v3498_v62 = vld [vmem:[#allocation50_spill] sm:$0xff] }
  0xc0   :  { %3469 = vst [vmem:[#allocation121_spill] sm:$0xff] %v2038_v23  ;;  %v3472_v32 = vsel %vm2043_vm11, 4294967295, %v3471_v32  ;;  %v912_v5 = vand.u32 2147483647, %v3474_v53  ;;  %v900_v6 = vand.u32 2147483647, %v899_v4  ;;  %v907_v61 = vcvt.s32.f32 %v906_v10 }
  0xc1   :  { %3470 = vst [vmem:[#allocation122_spill] sm:$0xff] %v2041_v2  ;;  %3473 = vst [vmem:[#allocation123_spill] sm:$0xff] %v3472_v32  ;;  %v914_v13 = vcvt.f32.s32 %v3474_v53  ;;  %v3475_v30 = vmov 0  ;;  %v917_v12 = vand.u32 2147483648, %v3474_v53  ;;  %v920_v40 = vand.u32 2147483647, %v1410_v9 }
  0xc2   :  { %vm2058_vm12 = vcmp.lt.f32.partialorder %v912_v5, 8388608.0  ;;  %v2064_v31 = vor.u32 %v901_v28, %v900_v6  ;;  %v908_v17 = vand.u32 2147483647, %v907_v61  ;;  %v922_v10 = vcvt.f32.s32 %v1410_v9  ;;  %v3482_v5 = vld [vmem:[#allocation47_spill] sm:$0xff] }
  0xc3   :  { %v3476_v30 = vsel %vm2058_vm12, 4294967295, %v3475_v30  ;;  %v915_v4 = vcvt.s32.f32 %v914_v13  ;;  %vm2067_vm13 = vcmp.lt.f32.partialorder %v920_v40, 8388608.0  ;;  %v3479_v41 = vmov 0  ;;  %v3502_v53 = vld [vmem:[#allocation51_spill] sm:$0xff] }
  0xc4   :  { %3477 = vst [vmem:[#allocation124_spill] sm:$0xff] %v3476_v30  ;;  %3478 = vst [vmem:[#allocation125_spill] sm:$0xff] %v2064_v31  ;;  %v3480_v41 = vsel %vm2067_vm13, 4294967295, %v3479_v41  ;;  %v925_v46 = vand.u32 2147483648, %v1410_v9  ;;  %v928_v60 = vand.u32 2147483647, %v3482_v5  ;;  %v930_v2 = vcvt.f32.s32 %v3482_v5 }
  0xc5   :  { %3481 = vst [vmem:[#allocation126_spill] sm:$0xff] %v3480_v41  ;;  %v2078_v6 = vor.u32 %v909_v25, %v908_v17  ;;  %v916_v61 = vand.u32 2147483647, %v915_v4  ;;  %v923_v13 = vcvt.s32.f32 %v922_v10  ;;  %v3484_v40 = vmov 0  ;;  %v3492_v10 = vld [vmem:[#allocation49_spill] sm:$0xff] }
  0xc6   :  { %vm2080_vm14 = vcmp.lt.f32.partialorder %v928_v60, 8388608.0  ;;  %v931_v44 = vcvt.s32.f32 %v930_v2  ;;  %v933_v23 = vand.u32 2147483648, %v3482_v5  ;;  %v936_v18 = vand.u32 2147483647, %v3487_v42  ;;  %v3512_v41 = vld [vmem:[#allocation53_spill] sm:$0xff] }
  0xc7   :  { %3483 = vst [vmem:[#allocation127_spill] sm:$0xff] %v2078_v6  ;;  %v3485_v40 = vsel %vm2080_vm14, 4294967295, %v3484_v40  ;;  %v2090_v20 = vor.u32 %v917_v12, %v916_v61  ;;  %v924_v17 = vand.u32 2147483647, %v923_v13  ;;  %v938_v25 = vcvt.f32.s32 %v3487_v42 }
  0xc8   :  { %3486 = vst [vmem:[#allocation128_spill] sm:$0xff] %v3485_v40  ;;  %v932_v4 = vand.u32 2147483647, %v931_v44  ;;  %vm2093_vm15 = vcmp.lt.f32.partialorder %v936_v18, 8388608.0  ;;  %v3489_v60 = vmov 0  ;;  %v941_v2 = vand.u32 2147483648, %v3487_v42 }
  0xc9   :  { %3488 = vst [vmem:[#allocation129_spill] sm:$0xff] %v2090_v20  ;;  %v3490_v60 = vsel %vm2093_vm15, 4294967295, %v3489_v60  ;;  %v944_v28 = vand.u32 2147483647, %v3492_v10  ;;  %v2103_v55 = vor.u32 %v925_v46, %v924_v17  ;;  %v939_v12 = vcvt.s32.f32 %v938_v25 }
  0xca   :  { %3491 = vst [vmem:[#allocation130_spill] sm:$0xff] %v3490_v60  ;;  %v946_v61 = vcvt.f32.s32 %v3492_v10  ;;  %v2106_v13 = vor.u32 %v933_v23, %v932_v4  ;;  %v3495_v18 = vmov 0  ;;  %v949_v44 = vand.u32 2147483648, %v3492_v10  ;;  %v3523_v10 = vld [vmem:[#allocation55_spill] sm:$0xff] }
  0xcb   :  { %3493 = vst [vmem:[#allocation131_spill] sm:$0xff] %v2103_v55  ;;  %vm2108_vm11 = vcmp.lt.f32.partialorder %v944_v28, 8388608.0  ;;  %v952_v6 = vand.u32 2147483647, %v3498_v62  ;;  %v940_v46 = vand.u32 2147483647, %v939_v12  ;;  %v954_v25 = vcvt.f32.s32 %v3498_v62 }
  0xcc   :  { %3494 = vst [vmem:[#allocation132_spill] sm:$0xff] %v2106_v13  ;;  %v3496_v18 = vsel %vm2108_vm11, 4294967295, %v3495_v18  ;;  %v947_v17 = vcvt.s32.f32 %v946_v61  ;;  %v3499_v28 = vmov 0  ;;  %v957_v4 = vand.u32 2147483648, %v3498_v62  ;;  %v3527_v62 = vld [vmem:[#allocation56_spill] sm:$0xff] }
  0xcd   :  { %3497 = vst [vmem:[#allocation133_spill] sm:$0xff] %v3496_v18  ;;  %vm2123_vm12 = vcmp.lt.f32.partialorder %v952_v6, 8388608.0  ;;  %v960_v20 = vand.u32 2147483647, %v3502_v53  ;;  %v2129_v30 = vor.u32 %v941_v2, %v940_v46  ;;  %v955_v12 = vcvt.s32.f32 %v954_v25  ;;  %v3507_v6 = vld [vmem:[#allocation52_spill] sm:$0xff] }
  0xce   :  { %v3500_v28 = vsel %vm2123_vm12, 4294967295, %v3499_v28  ;;  %v948_v32 = vand.u32 2147483647, %v947_v17  ;;  %v962_v61 = vcvt.f32.s32 %v3502_v53  ;;  %v3504_v9 = vmov 0 }
  0xcf   :  { %3501 = vst [vmem:[#allocation134_spill] sm:$0xff] %v3500_v28  ;;  %3503 = vst [vmem:[#allocation135_spill] sm:$0xff] %v2129_v30  ;;  %vm2132_vm13 = vcmp.lt.f32.partialorder %v960_v20, 8388608.0  ;;  %v965_v23 = vand.u32 2147483648, %v3502_v53  ;;  %v968_v5 = vand.u32 2147483647, %v3507_v6  ;;  %v970_v13 = vcvt.f32.s32 %v3507_v6 }
  0xd0   :  { %v3505_v9 = vsel %vm2132_vm13, 4294967295, %v3504_v9  ;;  %v2143_v46 = vor.u32 %v949_v44, %v948_v32  ;;  %v956_v17 = vand.u32 2147483647, %v955_v12  ;;  %v963_v25 = vcvt.s32.f32 %v962_v61  ;;  %v3517_v61 = vld [vmem:[#allocation54_spill] sm:$0xff] }
  0xd1   :  { %3506 = vst [vmem:[#allocation136_spill] sm:$0xff] %v3505_v9  ;;  %vm2145_vm14 = vcmp.lt.f32.partialorder %v968_v5, 8388608.0  ;;  %v3509_v20 = vmov 0  ;;  %v971_v40 = vcvt.s32.f32 %v970_v13  ;;  %v973_v55 = vand.u32 2147483648, %v3507_v6  ;;  %v3535_v9 = vld [vmem:[#allocation58_spill] sm:$0xff] }
  0xd2   :  { %3508 = vst [vmem:[#allocation137_spill] sm:$0xff] %v2143_v46  ;;  %v3510_v20 = vsel %vm2145_vm14, 4294967295, %v3509_v20  ;;  %v976_v26 = vand.u32 2147483647, %v3512_v41  ;;  %v2155_v60 = vor.u32 %v957_v4, %v956_v17  ;;  %v964_v32 = vand.u32 2147483647, %v963_v25 }
  0xd3   :  { %3511 = vst [vmem:[#allocation138_spill] sm:$0xff] %v3510_v20  ;;  %v978_v44 = vcvt.f32.s32 %v3512_v41  ;;  %v972_v12 = vand.u32 2147483647, %v971_v40  ;;  %v3514_v5 = vmov 0  ;;  %v981_v13 = vand.u32 2147483648, %v3512_v41 }
  0xd4   :  { %3513 = vst [vmem:[#allocation53_spill] sm:$0xff] %v2155_v60  ;;  %vm2158_vm15 = vcmp.lt.f32.partialorder %v976_v26, 8388608.0  ;;  %v984_v2 = vand.u32 2147483647, %v3517_v61  ;;  %v2168_v31 = vor.u32 %v965_v23, %v964_v32  ;;  %v986_v17 = vcvt.f32.s32 %v3517_v61 }
  0xd5   :  { %v3515_v5 = vsel %vm2158_vm15, 4294967295, %v3514_v5  ;;  %v979_v4 = vcvt.s32.f32 %v978_v44  ;;  %v2171_v25 = vor.u32 %v973_v55, %v972_v12  ;;  %v3520_v26 = vmov 0 }
  0xd6   :  { %3516 = vst [vmem:[#allocation139_spill] sm:$0xff] %v3515_v5  ;;  %3518 = vst [vmem:[#allocation140_spill] sm:$0xff] %v2168_v31  ;;  %vm2173_vm11 = vcmp.lt.f32.partialorder %v984_v2, 8388608.0  ;;  %v989_v40 = vand.u32 2147483648, %v3517_v61  ;;  %v992_v46 = vand.u32 2147483647, %v3523_v10  ;;  %v987_v32 = vcvt.s32.f32 %v986_v17 }
  0xd7   :  { %3519 = vst [vmem:[#allocation141_spill] sm:$0xff] %v2171_v25  ;;  %v3521_v26 = vsel %vm2173_vm11, 4294967295, %v3520_v26  ;;  %v980_v23 = vand.u32 2147483647, %v979_v4  ;;  %v994_v44 = vcvt.f32.s32 %v3523_v10  ;;  %v3524_v2 = vmov 0  ;;  %v3543_v61 = vld [vmem:[#allocation60_spill] sm:$0xff] }
  0xd8   :  { %3522 = vst [vmem:[#allocation142_spill] sm:$0xff] %v3521_v26  ;;  %vm2188_vm12 = vcmp.lt.f32.partialorder %v992_v46, 8388608.0  ;;  %v997_v12 = vand.u32 2147483648, %v3523_v10  ;;  %v1000_v60 = vand.u32 2147483647, %v3527_v62  ;;  %v1002_v17 = vcvt.f32.s32 %v3527_v62  ;;  %v3530_v46 = vld [vmem:[#allocation57_spill] sm:$0xff] }
  0xd9   :  { %v3525_v2 = vsel %vm2188_vm12, 4294967295, %v3524_v2  ;;  %v2194_v28 = vor.u32 %v981_v13, %v980_v23  ;;  %v988_v18 = vand.u32 2147483647, %v987_v32  ;;  %v995_v4 = vcvt.s32.f32 %v994_v44  ;;  %v3546_v10 = vld [vmem:[#allocation61_spill] sm:$0xff] }
  0xda   :  { %3526 = vst [vmem:[#allocation143_spill] sm:$0xff] %v3525_v2  ;;  %vm2197_vm13 = vcmp.lt.f32.partialorder %v1000_v60, 8388608.0  ;;  %v3528_v53 = vmov 0  ;;  %v1005_v55 = vand.u32 2147483648, %v3527_v62  ;;  %v1008_v6 = vand.u32 2147483647, %v3530_v46 }
  0xdb   :  { %v3529_v53 = vsel %vm2197_vm13, 4294967295, %v3528_v53  ;;  %v1010_v25 = vcvt.f32.s32 %v3530_v46  ;;  %v2208_v23 = vor.u32 %v989_v40, %v988_v18  ;;  %v996_v32 = vand.u32 2147483647, %v995_v4 }
  0xdc   :  { %v1003_v44 = vcvt.s32.f32 %v1002_v17  ;;  %vm2210_vm14 = vcmp.lt.f32.partialorder %v1008_v6, 8388608.0  ;;  %v3532_v60 = vmov 0  ;;  %v1013_v31 = vand.u32 2147483648, %v3530_v46  ;;  %v3539_v17 = vld [vmem:[#allocation59_spill] sm:$0xff] }
  0xdd   :  { %3531 = vst [vmem:[#allocation144_spill] sm:$0xff] %v2208_v23  ;;  %v3533_v60 = vsel %vm2210_vm14, 4294967295, %v3532_v60  ;;  %v1011_v20 = vcvt.s32.f32 %v1010_v25  ;;  %v1016_v42 = vand.u32 2147483647, %v3535_v9  ;;  %v2220_v5 = vor.u32 %v997_v12, %v996_v32 }
  0xde   :  { %3534 = vst [vmem:[#allocation145_spill] sm:$0xff] %v3533_v60  ;;  %v1004_v18 = vand.u32 2147483647, %v1003_v44  ;;  %v1018_v40 = vcvt.f32.s32 %v3535_v9  ;;  %v1021_v25 = vand.u32 2147483648, %v3535_v9  ;;  %v1024_v13 = vand.u32 2147483647, %v3539_v17 }
  0xdf   :  { %3536 = vst [vmem:[#allocation58_spill] sm:$0xff] %v2220_v5  ;;  %v1012_v4 = vand.u32 2147483647, %v1011_v20  ;;  %vm2223_vm15 = vcmp.lt.f32.partialorder %v1016_v42, 8388608.0  ;;  %v1026_v32 = vcvt.f32.s32 %v3539_v17  ;;  %v1029_v20 = vand.u32 2147483648, %v3539_v17  ;;  %v3572_v42 = vld [vmem:[#allocation70_spill] sm:$0xff] }
  0xe0   :  { %v2233_v30 = vor.u32 %v1005_v55, %v1004_v18  ;;  %v1019_v12 = vcvt.s32.f32 %v1018_v40  ;;  %vm2238_vm11 = vcmp.lt.f32.partialorder %v1024_v13, 8388608.0  ;;  %v1032_v23 = vand.u32 2147483647, %v3543_v61  ;;  %v3591_v13 = vld [vmem:[#allocation15_spill] sm:$0xff] }
  0xe1   :  { %v2236_v44 = vor.u32 %v1013_v31, %v1012_v4  ;;  %v1027_v18 = vcvt.s32.f32 %v1026_v32  ;;  %v1034_v40 = vcvt.f32.s32 %v3543_v61  ;;  %v1037_v4 = vand.u32 2147483648, %v3543_v61 }
  0xe2   :  { %v1020_v55 = vand.u32 2147483647, %v1019_v12  ;;  %vm2253_vm12 = vcmp.lt.f32.partialorder %v1032_v23, 8388608.0  ;;  %v1040_v5 = vand.u32 2147483647, %v3546_v10  ;;  %v1042_v32 = vcvt.f32.s32 %v3546_v10  ;;  %v3549_v23 = vld [vmem:[#allocation4_spill] sm:$0xff] }
  0xe3   :  { %3540 = vst [vmem:[#allocation59_spill] sm:$0xff] %v2236_v44  ;;  %v1028_v26 = vand.u32 2147483647, %v1027_v18  ;;  %v1035_v12 = vcvt.s32.f32 %v1034_v40  ;;  %v1045_v31 = vand.u32 2147483648, %v3546_v10  ;;  %v3550_v46 = vsel %vm1465_vm0, %v1487_v57, %v3549_v23  ;;  %v3554_v57 = vld [vmem:[#allocation6_spill] sm:$0xff] }
  0xe4   :  { %v2259_v2 = vor.u32 %v1021_v25, %v1020_v55  ;;  %vm2262_vm13 = vcmp.lt.f32.partialorder %v1040_v5, 8388608.0  ;;  %v2272_v44 = vclamps-f32 %v3550_v46, 127.0  ;;  %v3551_v25 = vld [vmem:[#allocation5_spill] sm:$0xff]  ;;  %v1043_v60 = vcvt.s32.f32 %v1042_v32  ;;  %v3565_v23 = vld [vmem:[#allocation66_spill] sm:$0xff]  ;;  %v3718_v5 = vld [vmem:[#allocation119_spill] sm:$0xff] }
  0xe5   :  { %v3552_v55 = vsel %vm1469_vm1, %v1494_v15, %v3551_v25  ;;  %v2285_v40 = vor.u32 %v1029_v20, %v1028_v26  ;;  %v1036_v48 = vand.u32 2147483647, %v1035_v12  ;;  %v3555_v46 = vsel %vm1474_vm2, %v1496_v14, %v3554_v57  ;;  %v3557_v15 = vld [vmem:[#allocation7_spill] sm:$0xff]  ;;  %v3560_v26 = vld [vmem:[#allocation64_spill] sm:$0xff] }
  0xe6   :  { %v2279_v18 = vclamps-f32 %v3552_v55, 127.0  ;;  %v2292_v8 = vclamps-f32 %v3555_v46, 127.0  ;;  %v3558_v25 = vsel %vm1482_vm3, %v1517_v47, %v3557_v15  ;;  %v3561_v20 = vld [vmem:[#allocation8_spill] sm:$0xff]  ;;  %v3563_v14 = vsel %vm1513_vm5, %v1543_v7, %v1173_v36  ;;  %v3566_v15 = vld [vmem:[#allocation9_spill] sm:$0xff]  ;;  %v3569_v36 = vld [vmem:[#allocation10_spill] sm:$0xff] }
  0xe7   :  { %v2299_v55 = vclamps-f32 %v3558_v25, 127.0  ;;  %v3562_v12 = vsel %vm1489_vm4, %v3560_v26, %v3561_v20  ;;  %v2313_v33 = vclamps-f32 %v3563_v14, 127.0  ;;  %v1031_v47 = vsel %vm2238_vm11, %v2285_v40, %v3539_v17  ;;  %v3573_v17 = vld [vmem:[#allocation11_spill] sm:$0xff]  ;;  %v3577_v14 = vld [vmem:[#allocation12_spill] sm:$0xff] }
  0xe8   :  { %3553 = vst [vmem:[#allocation60_spill] sm:$0xff] %v2279_v18  ;;  %v2306_v32 = vclamps-f32 %v3562_v12, 127.0  ;;  %v1038_v57 = vor.u32 %v1037_v4, %v1036_v48  ;;  %v1044_v46 = vand.u32 2147483647, %v1043_v60  ;;  %v3567_v25 = vsel %vm1530_vm6, %v3565_v23, %v3566_v15  ;;  %v3576_v48 = vld [vmem:[#allocation72_spill] sm:$0xff] }
  0xe9   :  { %v2324_v26 = vclamps-f32 %v3567_v25, 127.0  ;;  %v3570_v7 = vsel %vm1538_vm7, %v3568_v0, %v3569_v36  ;;  %v3574_v4 = vsel %vm1556_vm8, %v3572_v42, %v3573_v17  ;;  %v3578_v18 = vsel %vm1562_vm9, %v3576_v48, %v3577_v14  ;;  %v3585_v17 = vld [vmem:[#allocation75_spill] sm:$0xff]  ;;  %v3590_v48 = vld [vmem:[#allocation77_spill] sm:$0xff] }
  0xea   :  { %v2331_v20 = vclamps-f32 %v3570_v7, 127.0  ;;  %v2338_v60 = vclamps-f32 %v3574_v4, 127.0  ;;  %v2345_v23 = vclamps-f32 %v3578_v18, 127.0  ;;  %v3580_v15 = vsel %vm1581_vm10, %v1609_v24, %v1200_v45  ;;  %v3582_v7 = vld [vmem:[#allocation13_spill] sm:$0xff]  ;;  %v3586_v4 = vld [vmem:[#allocation14_spill] sm:$0xff] }
  0xeb   :  { %v2352_v25 = vclamps-f32 %v3580_v15, 127.0  ;;  %v1039_v0 = vsel %vm2253_vm12, %v1038_v57, %v3543_v61  ;;  %v1046_v36 = vor.u32 %v1045_v31, %v1044_v46  ;;  %vm3581_vm0 = vnez %v3345_v22  ;;  %v3588_v24 = vld [vmem:[#allocation73_spill] sm:$0xff]  ;;  %v3593_v22 = vld [vmem:[#allocation74_spill] sm:$0xff] }
  0xec   :  { %v3583_v12 = vsel %vm3581_vm0, %v1623_v63, %v3582_v7  ;;  %vm3584_vm1 = vnez %v3347_v58  ;;  %vm3589_vm2 = vnez %v3588_v24  ;;  %vm3594_vm3 = vnez %v3593_v22  ;;  %v3595_v57 = vld [vmem:[#allocation78_spill] sm:$0xff]  ;;  %v3596_v63 = vld [vmem:[#allocation16_spill] sm:$0xff]  ;;  %v3602_v15 = vld [vmem:[#allocation17_spill] sm:$0xff] }
  0xed   :  { %v2362_v42 = vclamps-f32 %v3583_v12, 127.0  ;;  %v3587_v40 = vsel %vm3584_vm1, %v3585_v17, %v3586_v4  ;;  %v3592_v61 = vsel %vm3589_vm2, %v3590_v48, %v3591_v13  ;;  %v3597_v46 = vsel %vm3594_vm3, %v3595_v57, %v3596_v63  ;;  %v3598_v58 = vld [vmem:[#allocation76_spill] sm:$0xff]  ;;  %v3605_v4 = vld [vmem:[#allocation81_spill] sm:$0xff] }
  0xee   :  { %v2369_v45 = vclamps-f32 %v3587_v40, 127.0  ;;  %v2376_v31 = vclamps-f32 %v3592_v61, 127.0  ;;  %v2383_v14 = vclamps-f32 %v3597_v46, 127.0  ;;  %vm3599_vm4 = vnez %v3598_v58  ;;  %v3606_v40 = vld [vmem:[#allocation18_spill] sm:$0xff]  ;;  %v3615_v22 = vld [vmem:[#allocation84_spill] sm:$0xff]  ;;  %v3622_v46 = vld [vmem:[#allocation21_spill] sm:$0xff] }
  0xef   :  { %v3600_v18 = vsel %vm3599_vm4, %v1674_v21, %v1227_v54  ;;  %vm3601_vm5 = vnez %v3361_v37  ;;  %v1047_v17 = vsel %vm2262_vm13, %v1046_v36, %v3546_v10  ;;  %vm3604_vm6 = vnez %v3363_v1  ;;  %v3608_v54 = vld [vmem:[#allocation79_spill] sm:$0xff]  ;;  %v3616_v57 = vld [vmem:[#allocation20_spill] sm:$0xff]  ;;  %v3618_v1 = vld [vmem:[#allocation82_spill] sm:$0xff] }
  0xf0   :  { %v2390_v39 = vclamps-f32 %v3600_v18, 127.0  ;;  %v3603_v7 = vsel %vm3601_vm5, %v1688_v27, %v3602_v15  ;;  %v3607_v24 = vsel %vm3604_vm6, %v3605_v4, %v3606_v40  ;;  %vm3609_vm7 = vnez %v3608_v54  ;;  %v3610_v21 = vld [vmem:[#allocation83_spill] sm:$0xff]  ;;  %v3613_v27 = vld [vmem:[#allocation80_spill] sm:$0xff]  ;;  %v3630_v54 = vld [vmem:[#allocation89_spill] sm:$0xff] }
  0xf1   :  { %v2397_v12 = vclamps-f32 %v3603_v7, 127.0  ;;  %v2407_v48 = vclamps-f32 %v3607_v24, 127.0  ;;  %v3611_v37 = vld [vmem:[#allocation19_spill] sm:$0xff]  ;;  %vm3614_vm8 = vnez %v3613_v27  ;;  %vm3619_vm9 = vnez %v3618_v1  ;;  %v3626_v7 = vld [vmem:[#allocation22_spill] sm:$0xff]  ;;  %v3628_v24 = vld [vmem:[#allocation85_spill] sm:$0xff] }
  0xf2   :  { %v3612_v13 = vsel %vm3609_vm7, %v3610_v21, %v3611_v37  ;;  %v3617_v62 = vsel %vm3614_vm8, %v3615_v22, %v3616_v57  ;;  %v3620_v36 = vsel %vm3619_vm9, %v1739_v34, %v1263_v3  ;;  %vm3621_vm10 = vnez %v3377_v50  ;;  %v3625_v15 = vld [vmem:[#allocation87_spill] sm:$0xff]  ;;  %v3633_v50 = vld [vmem:[#allocation86_spill] sm:$0xff] }
  0xf3   :  { %v2414_v61 = vclamps-f32 %v3612_v13, 127.0  ;;  %v2421_v10 = vclamps-f32 %v3617_v62, 127.0  ;;  %v2428_v63 = vclamps-f32 %v3620_v36, 127.0  ;;  %v3623_v58 = vsel %vm3621_vm10, %v1753_v49, %v3622_v46  ;;  %v3631_v3 = vld [vmem:[#allocation23_spill] sm:$0xff]  ;;  %v3635_v37 = vld [vmem:[#allocation90_spill] sm:$0xff]  ;;  %v3636_v49 = vld [vmem:[#allocation24_spill] sm:$0xff] }
  0xf4   :  { %v2435_v18 = vclamps-f32 %v3623_v58, 127.0  ;;  %vm3624_vm11 = vnez %v3379_v16  ;;  %vm3629_vm12 = vnez %v3628_v24  ;;  %vm3634_vm13 = vnez %v3633_v50  ;;  %v3638_v16 = vld [vmem:[#allocation88_spill] sm:$0xff]  ;;  %v3642_v62 = vld [vmem:[#allocation25_spill] sm:$0xff]  ;;  %v3646_v58 = vld [vmem:[#allocation26_spill] sm:$0xff] }
  0xf5   :  { %v3627_v4 = vsel %vm3624_vm11, %v3625_v15, %v3626_v7  ;;  %v3632_v34 = vsel %vm3629_vm12, %v3630_v54, %v3631_v3  ;;  %v3637_v13 = vsel %vm3634_vm13, %v3635_v37, %v3636_v49  ;;  %vm3639_vm0 = vnez %v3638_v16  ;;  %v3645_v46 = vld [vmem:[#allocation93_spill] sm:$0xff]  ;;  %v3650_v24 = vld [vmem:[#allocation95_spill] sm:$0xff]  ;;  %v3655_v3 = vld [vmem:[#allocation96_spill] sm:$0xff] }
  0xf6   :  { %v2442_v40 = vclamps-f32 %v3627_v4, 127.0  ;;  %v2449_v21 = vclamps-f32 %v3632_v34, 127.0  ;;  %v2456_v27 = vclamps-f32 %v3637_v13, 127.0  ;;  %v3640_v22 = vsel %vm3639_vm0, %v1804_v56, %v1287_v11  ;;  %v3648_v4 = vld [vmem:[#allocation91_spill] sm:$0xff]  ;;  %v3662_v13 = vld [vmem:[#allocation29_spill] sm:$0xff] }
  0xf7   :  { %v2463_v57 = vclamps-f32 %v3640_v22, 127.0  ;;  %vm3641_vm1 = vnez %v3393_v43  ;;  %vm3644_vm2 = vnez %v3395_v29  ;;  %vm3649_vm3 = vnez %v3648_v4  ;;  %v3651_v11 = vld [vmem:[#allocation27_spill] sm:$0xff]  ;;  %v3653_v43 = vld [vmem:[#allocation92_spill] sm:$0xff]  ;;  %v3658_v29 = vld [vmem:[#allocation94_spill] sm:$0xff] }
  0xf8   :  { %v3643_v1 = vsel %vm3641_vm1, %v1818_v38, %v3642_v62  ;;  %v3647_v15 = vsel %vm3644_vm2, %v3645_v46, %v3646_v58  ;;  %v3652_v56 = vsel %vm3649_vm3, %v3650_v24, %v3651_v11  ;;  %vm3654_vm4 = vnez %v3653_v43  ;;  %v3656_v38 = vld [vmem:[#allocation28_spill] sm:$0xff]  ;;  %v3664_v62 = vld [vmem:[#allocation97_spill] sm:$0xff]  ;;  %v3667_v46 = vld [vmem:[#allocation30_spill] sm:$0xff] }
  0xf9   :  { %v2470_v36 = vclamps-f32 %v3643_v1, 127.0  ;;  %v2477_v7 = vclamps-f32 %v3647_v15, 127.0  ;;  %v2484_v54 = vclamps-f32 %v3652_v56, 127.0  ;;  %v3657_v34 = vsel %vm3654_vm4, %v3655_v3, %v3656_v38  ;;  %v3666_v1 = vld [vmem:[#allocation100_spill] sm:$0xff]  ;;  %v3669_v4 = vld [vmem:[#allocation98_spill] sm:$0xff]  ;;  %v3676_v56 = vld [vmem:[#allocation103_spill] sm:$0xff] }
  0xfa   :  { %v2491_v50 = vclamps-f32 %v3657_v34, 127.0  ;;  %vm3659_vm5 = vnez %v3658_v29  ;;  %vm3661_vm6 = vnez %v3409_v52  ;;  %vm3665_vm7 = vnez %v3664_v62  ;;  %v3671_v24 = vld [vmem:[#allocation102_spill] sm:$0xff]  ;;  %v3674_v52 = vld [vmem:[#allocation99_spill] sm:$0xff]  ;;  %v3679_v38 = vld [vmem:[#allocation101_spill] sm:$0xff] }
  0xfb   :  { %v3660_v37 = vsel %vm3659_vm5, %v1869_v35, %v1311_v19  ;;  %v3663_v16 = vsel %vm3661_vm6, %v1883_v51, %v3662_v13  ;;  %v3668_v58 = vsel %vm3665_vm7, %v3666_v1, %v3667_v46  ;;  %vm3670_vm8 = vnez %v3669_v4  ;;  %v3672_v19 = vld [vmem:[#allocation31_spill] sm:$0xff]  ;;  %v3677_v51 = vld [vmem:[#allocation32_spill] sm:$0xff]  ;;  %v3681_v34 = vld [vmem:[#allocation106_spill] sm:$0xff] }
  0xfc   :  { %v2498_v49 = vclamps-f32 %v3660_v37, 127.0  ;;  %v2505_v22 = vclamps-f32 %v3663_v16, 127.0  ;;  %v2512_v15 = vclamps-f32 %v3668_v58, 127.0  ;;  %v3673_v35 = vsel %vm3670_vm8, %v3671_v24, %v3672_v19  ;;  %v3682_v29 = vld [vmem:[#allocation33_spill] sm:$0xff]  ;;  %v3684_v16 = vld [vmem:[#allocation104_spill] sm:$0xff]  ;;  %v3687_v1 = vld [vmem:[#allocation34_spill] sm:$0xff] }
  0xfd   :  { %v2519_v11 = vclamps-f32 %v3673_v35, 127.0  ;;  %vm3675_vm9 = vnez %v3674_v52  ;;  %vm3680_vm10 = vnez %v3679_v38  ;;  %vm3685_vm11 = vnez %v3684_v16  ;;  %v3686_v62 = vld [vmem:[#allocation108_spill] sm:$0xff]  ;;  %v3689_v4 = vld [vmem:[#allocation105_spill] sm:$0xff]  ;;  %v3691_v24 = vld [vmem:[#allocation110_spill] sm:$0xff] }
  0xfe   :  { %v3678_v43 = vsel %vm3675_vm9, %v3676_v56, %v3677_v51  ;;  %v3683_v37 = vsel %vm3680_vm10, %v3681_v34, %v3682_v29  ;;  %v3688_v46 = vsel %vm3685_vm11, %v3686_v62, %v3687_v1  ;;  %vm3690_vm12 = vnez %v3689_v4  ;;  %v3692_v19 = vld [vmem:[#allocation35_spill] sm:$0xff]  ;;  %v3696_v51 = vld [vmem:[#allocation112_spill] sm:$0xff]  ;;  %v3699_v29 = vld [vmem:[#allocation109_spill] sm:$0xff] }
  0xff   :  { %v2526_v3 = vclamps-f32 %v3678_v43, 127.0  ;;  %v2533_v13 = vclamps-f32 %v3683_v37, 127.0  ;;  %v2540_v58 = vclamps-f32 %v3688_v46, 127.0  ;;  %v3693_v35 = vsel %vm3690_vm12, %v3691_v24, %v3692_v19  ;;  %v3694_v56 = vld [vmem:[#allocation107_spill] sm:$0xff]  ;;  %v3697_v43 = vld [vmem:[#allocation36_spill] sm:$0xff]  ;;  %v3701_v37 = vld [vmem:[#allocation113_spill] sm:$0xff] }
 0x100   :  { %v2547_v52 = vclamps-f32 %v3693_v35, 127.0  ;;  %vm3695_vm13 = vnez %v3694_v56  ;;  %vm3700_vm0 = vnez %v3699_v29  ;;  %v3702_v16 = vld [vmem:[#allocation37_spill] sm:$0xff]  ;;  %v3705_v46 = vld [vmem:[#allocation111_spill] sm:$0xff]  ;;  %v3707_v4 = vld [vmem:[#allocation38_spill] sm:$0xff] }
 0x101   :  { %v3698_v38 = vsel %vm3695_vm13, %v3696_v51, %v3697_v43  ;;  %v3703_v62 = vsel %vm3700_vm0, %v3701_v37, %v3702_v16  ;;  %vm3706_vm1 = vnez %v3705_v46  ;;  %v3710_v35 = vld [vmem:[#allocation114_spill] sm:$0xff]  ;;  %v3712_v56 = vld [vmem:[#allocation117_spill] sm:$0xff]  ;;  %v3713_v51 = vld [vmem:[#allocation39_spill] sm:$0xff] }
 0x102   :  { %v2554_v34 = vclamps-f32 %v3698_v38, 127.0  ;;  %v2561_v1 = vclamps-f32 %v3703_v62, 127.0  ;;  %v3708_v24 = vsel %vm3706_vm1, %v1999_v59, %v3707_v4  ;;  %vm3711_vm2 = vnez %v3710_v35  ;;  %v3716_v29 = vld [vmem:[#allocation115_spill] sm:$0xff]  ;;  %v3719_v37 = vld [vmem:[#allocation40_spill] sm:$0xff]  ;;  %v3725_v59 = vld [vmem:[#allocation41_spill] sm:$0xff] }
 0x103   :  { %v2568_v19 = vclamps-f32 %v3708_v24, 127.0  ;;  %v3714_v43 = vsel %vm3711_vm2, %v3712_v56, %v3713_v51  ;;  %vm3717_vm3 = vnez %v3716_v29  ;;  %v3722_v46 = vld [vmem:[#allocation116_spill] sm:$0xff]  ;;  %v3728_v35 = vld [vmem:[#allocation118_spill] sm:$0xff] }
 0x104   :  { %3704 = vst [vmem:[#allocation61_spill] sm:$0xff] %v2561_v1  ;;  %v2575_v38 = vclamps-f32 %v3714_v43, 127.0  ;;  %v3720_v16 = vsel %vm3717_vm3, %v3718_v5, %v3719_v37  ;;  %vm3723_vm4 = vnez %v3722_v46  ;;  %v3724_v1 = vld [vmem:[#allocation121_spill] sm:$0xff]  ;;  %vm3729_vm5 = vnez %v3728_v35  ;;  %v3731_v56 = vld [vmem:[#allocation42_spill] sm:$0xff]  ;;  %v3734_v29 = vld [vmem:[#allocation120_spill] sm:$0xff] }
 0x105   :  { %3709 = vst [vmem:[#allocation4_spill] sm:$0xff] %v2568_v19  ;;  %v2582_v62 = vclamps-f32 %v3720_v16, 127.0  ;;  %v3726_v4 = vsel %vm3723_vm4, %v3724_v1, %v3725_v59  ;;  %v3730_v19 = vld [vmem:[#allocation122_spill] sm:$0xff]  ;;  %vm3735_vm6 = vnez %v3734_v29  ;;  %v3737_v5 = vld [vmem:[#allocation43_spill] sm:$0xff]  ;;  %v3743_v1 = vld [vmem:[#allocation44_spill] sm:$0xff] }
 0x106   :  { %3715 = vst [vmem:[#allocation5_spill] sm:$0xff] %v2575_v38  ;;  %v2589_v24 = vclamps-f32 %v3726_v4, 127.0  ;;  %v3732_v51 = vsel %vm3729_vm5, %v3730_v19, %v3731_v56  ;;  %v3736_v38 = vld [vmem:[#allocation125_spill] sm:$0xff]  ;;  %v3740_v46 = vld [vmem:[#allocation123_spill] sm:$0xff]  ;;  %v3746_v35 = vld [vmem:[#allocation124_spill] sm:$0xff]  ;;  %vm3804_vm5 = vnez %v3529_v53  ;;  %v2710_v53 = vclamps-f32 %v1031_v47, 127.0 }
 0x107   :  { %3721 = vst [vmem:[#allocation6_spill] sm:$0xff] %v2582_v62  ;;  %v2596_v43 = vclamps-f32 %v3732_v51, 127.0  ;;  %v3738_v37 = vsel %vm3735_vm6, %v3736_v38, %v3737_v5  ;;  %vm3741_vm7 = vnez %v3740_v46  ;;  %v3742_v62 = vld [vmem:[#allocation127_spill] sm:$0xff]  ;;  %vm3747_vm8 = vnez %v3746_v35  ;;  %v3749_v19 = vld [vmem:[#allocation45_spill] sm:$0xff]  ;;  %v3752_v29 = vld [vmem:[#allocation126_spill] sm:$0xff] }
 0x108   :  { %3727 = vst [vmem:[#allocation62_spill] sm:$0xff] %v2589_v24  ;;  %v2603_v16 = vclamps-f32 %v3738_v37, 127.0  ;;  %v3744_v59 = vsel %vm3741_vm7, %v3742_v62, %v3743_v1  ;;  %v3748_v24 = vld [vmem:[#allocation129_spill] sm:$0xff]  ;;  %vm3753_vm9 = vnez %v3752_v29  ;;  %v3755_v38 = vld [vmem:[#allocation46_spill] sm:$0xff]  ;;  %v3758_v46 = vld [vmem:[#allocation128_spill] sm:$0xff] }
 0x109   :  { %3733 = vst [vmem:[#allocation7_spill] sm:$0xff] %v2596_v43  ;;  %v2610_v4 = vclamps-f32 %v3744_v59, 127.0  ;;  %v3750_v56 = vsel %vm3747_vm8, %v3748_v24, %v3749_v19  ;;  %v3754_v43 = vld [vmem:[#allocation131_spill] sm:$0xff]  ;;  %vm3759_vm10 = vnez %v3758_v46  ;;  %v3764_v35 = vld [vmem:[#allocation130_spill] sm:$0xff]  ;;  %v3767_v24 = vld [vmem:[#allocation48_spill] sm:$0xff] }
 0x10a   :  { %3739 = vst [vmem:[#allocation63_spill] sm:$0xff] %v2603_v16  ;;  %v2617_v51 = vclamps-f32 %v3750_v56, 127.0  ;;  %v3756_v5 = vsel %vm3753_vm9, %v3754_v43, %v3755_v38  ;;  %v3760_v16 = vld [vmem:[#allocation132_spill] sm:$0xff]  ;;  %v3761_v62 = vld [vmem:[#allocation47_spill] sm:$0xff]  ;;  %vm3765_vm11 = vnez %v3764_v35  ;;  %v3770_v29 = vld [vmem:[#allocation133_spill] sm:$0xff] }
 0x10b   :  { %3745 = vst [vmem:[#allocation64_spill] sm:$0xff] %v2610_v4  ;;  %v2624_v37 = vclamps-f32 %v3756_v5, 127.0  ;;  %v3762_v1 = vsel %vm3759_vm10, %v3760_v16, %v3761_v62  ;;  %v3766_v4 = vld [vmem:[#allocation135_spill] sm:$0xff]  ;;  %vm3771_vm12 = vnez %v3770_v29  ;;  %v3773_v43 = vld [vmem:[#allocation49_spill] sm:$0xff]  ;;  %v3775_v46 = vld [vmem:[#allocation134_spill] sm:$0xff] }
 0x10c   :  { %3751 = vst [vmem:[#allocation8_spill] sm:$0xff] %v2617_v51  ;;  %v2631_v59 = vclamps-f32 %v3762_v1, 127.0  ;;  %v3768_v19 = vsel %vm3765_vm11, %v3766_v4, %v3767_v24  ;;  %v3772_v51 = vld [vmem:[#allocation137_spill] sm:$0xff]  ;;  %vm3776_vm13 = vnez %v3775_v46  ;;  %v3778_v16 = vld [vmem:[#allocation50_spill] sm:$0xff]  ;;  %v3780_v35 = vld [vmem:[#allocation136_spill] sm:$0xff] }
 0x10d   :  { %3757 = vst [vmem:[#allocation65_spill] sm:$0xff] %v2624_v37  ;;  %v2638_v56 = vclamps-f32 %v3768_v19, 127.0  ;;  %v3774_v38 = vsel %vm3771_vm12, %v3772_v51, %v3773_v43  ;;  %v3777_v37 = vld [vmem:[#allocation53_spill] sm:$0xff]  ;;  %vm3781_vm0 = vnez %v3780_v35  ;;  %v3783_v4 = vld [vmem:[#allocation51_spill] sm:$0xff]  ;;  %v3786_v29 = vld [vmem:[#allocation138_spill] sm:$0xff] }
 0x10e   :  { %3763 = vst [vmem:[#allocation66_spill] sm:$0xff] %v2631_v59  ;;  %v2645_v5 = vclamps-f32 %v3774_v38, 127.0  ;;  %v3779_v62 = vsel %vm3776_vm13, %v3777_v37, %v3778_v16  ;;  %v3782_v59 = vld [vmem:[#allocation140_spill] sm:$0xff]  ;;  %vm3787_vm1 = vnez %v3786_v29  ;;  %v3791_v46 = vld [vmem:[#allocation139_spill] sm:$0xff] }
 0x10f   :  { %3769 = vst [vmem:[#allocation9_spill] sm:$0xff] %v2638_v56  ;;  %v2652_v1 = vclamps-f32 %v3779_v62, 127.0  ;;  %v3784_v24 = vsel %vm3781_vm0, %v3782_v59, %v3783_v4  ;;  %v3788_v56 = vld [vmem:[#allocation141_spill] sm:$0xff]  ;;  %v3789_v51 = vld [vmem:[#allocation52_spill] sm:$0xff]  ;;  %vm3792_vm2 = vnez %v3791_v46  ;;  %v3794_v62 = vld [vmem:[#allocation142_spill] sm:$0xff] }
 0x110   :  { %v2659_v19 = vclamps-f32 %v3784_v24, 127.0  ;;  %v3790_v43 = vsel %vm3787_vm1, %v3788_v56, %v3789_v51  ;;  %v3793_v37 = vsel %vm3792_vm2, %v2194_v28, %v3512_v41  ;;  %vm3795_vm3 = vnez %v3794_v62  ;;  %v3796_v35 = vld [vmem:[#allocation144_spill] sm:$0xff]  ;;  %v3797_v59 = vld [vmem:[#allocation54_spill] sm:$0xff]  ;;  %v3799_v29 = vld [vmem:[#allocation143_spill] sm:$0xff] }
 0x111   :  { %v2666_v38 = vclamps-f32 %v3790_v43, 127.0  ;;  %v2673_v16 = vclamps-f32 %v3793_v37, 127.0  ;;  %v3798_v4 = vsel %vm3795_vm3, %v3796_v35, %v3797_v59  ;;  %vm3800_vm4 = vnez %v3799_v29  ;;  %v3802_v56 = vld [vmem:[#allocation55_spill] sm:$0xff]  ;;  %v3805_v41 = vld [vmem:[#allocation56_spill] sm:$0xff]  ;;  %v3809_v35 = vld [vmem:[#allocation57_spill] sm:$0xff] }
 0x112   :  { %3785 = vst [vmem:[#allocation68_spill] sm:$0xff] %v2659_v19  ;;  %v2680_v24 = vclamps-f32 %v3798_v4, 127.0  ;;  %v3801_v19 = vld [vmem:[#allocation58_spill] sm:$0xff]  ;;  %v3806_v28 = vsel %vm3804_vm5, %v2233_v30, %v3805_v41  ;;  %v3808_v62 = vld [vmem:[#allocation59_spill] sm:$0xff]  ;;  %v2714_v30 = vclamps-f32 %v1047_v17, 127.0 }
 0x113   :  { %v3803_v51 = vsel %vm3800_vm4, %v3801_v19, %v3802_v56  ;;  %v2694_v46 = vclamps-f32 %v3806_v28, 127.0  ;;  %v3810_v59 = vsel %vm2210_vm14, %v3808_v62, %v3809_v35  ;;  %v3811_v19 = vsel %vm2223_vm15, %v2259_v2, %v3535_v9  ;;  %v3813_v28 = vld [vmem:[#allocation60_spill] sm:$0xff]  ;;  %v3818_v35 = vld [vmem:[#allocation62_spill] sm:$0xff] }
 0x114   :  { %v2687_v43 = vclamps-f32 %v3803_v51, 127.0  ;;  %v2701_v4 = vclamps-f32 %v3810_v59, 127.0  ;;  %v2708_v29 = vclamps-f32 %v3811_v19, 127.0  ;;  %v2712_v56 = vclamps-f32 %v1039_v0, 127.0  ;;  %v3812_v51 = vld [vmem:[#allocation3_spill] sm:$0xff] }
 0x115   :  { %v338_v41 = vmul.f32 %v2272_v44, %v3812_v51  ;;  %v339_v37 = vmul.f32 %v3813_v28, %v3812_v51  ;;  %v340_v6 = vmul.f32 %v2292_v8, %v3812_v51  ;;  %v341_v9 = vmul.f32 %v2299_v55, %v3812_v51  ;;  %v3819_v19 = vld [vmem:[#allocation7_spill] sm:$0xff] }
 0x116   :  { %v342_v2 = vmul.f32 %v2306_v32, %v3812_v51  ;;  %v343_v47 = vmul.f32 %v2313_v33, %v3812_v51  ;;  %v344_v0 = vmul.f32 %v2324_v26, %v3812_v51  ;;  %v345_v44 = vmul.f32 %v2331_v20, %v3812_v51  ;;  %v3820_v28 = vld [vmem:[#allocation63_spill] sm:$0xff] }
 0x117   :  { %v346_v17 = vmul.f32 %v2338_v60, %v3812_v51  ;;  %v347_v8 = vmul.f32 %v2345_v23, %v3812_v51  ;;  %v348_v55 = vmul.f32 %v2352_v25, %v3812_v51  ;;  %v349_v32 = vmul.f32 %v2362_v42, %v3812_v51  ;;  %402 = vst [vmem:[%s3038_s2] sm:$0xff] %v338_v41 }
 0x118   :  { %403 = vst [vmem:[%s3038_s2 + $0x8] sm:$0xff] %v339_v37  ;;  %404 = vst [vmem:[%s3038_s2 + $0x10] sm:$0xff] %v340_v6  ;;  %v350_v33 = vmul.f32 %v2369_v45, %v3812_v51  ;;  %v351_v26 = vmul.f32 %v2376_v31, %v3812_v51  ;;  %v352_v20 = vmul.f32 %v2383_v14, %v3812_v51  ;;  %v3821_v6 = vld [vmem:[#allocation64_spill] sm:$0xff] }
 0x119   :  { %405 = vst [vmem:[%s3038_s2 + $0x18] sm:$0xff] %v341_v9  ;;  %v353_v60 = vmul.f32 %v2390_v39, %v3812_v51  ;;  %406 = vst [vmem:[%s3038_s2 + $0x20] sm:$0xff] %v342_v2  ;;  %v354_v23 = vmul.f32 %v2397_v12, %v3812_v51  ;;  %v355_v25 = vmul.f32 %v2407_v48, %v3812_v51  ;;  %v3822_v2 = vld [vmem:[#allocation8_spill] sm:$0xff] }
 0x11a   :  { %407 = vst [vmem:[%s3038_s2 + $0x28] sm:$0xff] %v343_v47  ;;  %408 = vst [vmem:[%s3038_s2 + $0x30] sm:$0xff] %v344_v0  ;;  %v356_v42 = vmul.f32 %v2414_v61, %v3812_v51  ;;  %v357_v45 = vmul.f32 %v2421_v10, %v3812_v51  ;;  %v358_v31 = vmul.f32 %v2428_v63, %v3812_v51  ;;  %v3823_v0 = vld [vmem:[#allocation65_spill] sm:$0xff] }
 0x11b   :  { %409 = vst [vmem:[%s3038_s2 + $0x38] sm:$0xff] %v345_v44  ;;  %410 = vst [vmem:[%s3038_s2 + $0x40] sm:$0xff] %v346_v17  ;;  %v359_v14 = vmul.f32 %v2435_v18, %v3812_v51  ;;  %v360_v39 = vmul.f32 %v2442_v40, %v3812_v51  ;;  %v361_v12 = vmul.f32 %v2449_v21, %v3812_v51  ;;  %v3824_v17 = vld [vmem:[#allocation66_spill] sm:$0xff] }
 0x11c   :  { %411 = vst [vmem:[%s3038_s2 + $0x48] sm:$0xff] %v347_v8  ;;  %412 = vst [vmem:[%s3038_s2 + $0x50] sm:$0xff] %v348_v55  ;;  %v362_v48 = vmul.f32 %v2456_v27, %v3812_v51  ;;  %v363_v61 = vmul.f32 %v2463_v57, %v3812_v51  ;;  %v364_v10 = vmul.f32 %v2470_v36, %v3812_v51  ;;  %v3825_v55 = vld [vmem:[#allocation9_spill] sm:$0xff] }
 0x11d   :  { %413 = vst [vmem:[%s3038_s2 + $0x58] sm:$0xff] %v349_v32  ;;  %414 = vst [vmem:[%s3038_s2 + $0x60] sm:$0xff] %v350_v33  ;;  %v365_v63 = vmul.f32 %v2477_v7, %v3812_v51  ;;  %v366_v18 = vmul.f32 %v2484_v54, %v3812_v51  ;;  %v367_v40 = vmul.f32 %v2491_v50, %v3812_v51 }
 0x11e   :  { %415 = vst [vmem:[%s3038_s2 + $0x68] sm:$0xff] %v351_v26  ;;  %416 = vst [vmem:[%s3038_s2 + $0x70] sm:$0xff] %v352_v20  ;;  %v368_v21 = vmul.f32 %v2498_v49, %v3812_v51  ;;  %v369_v27 = vmul.f32 %v2505_v22, %v3812_v51  ;;  %v370_v57 = vmul.f32 %v2512_v15, %v3812_v51  ;;  %v3814_v15 = vld [vmem:[#allocation61_spill] sm:$0xff] }
 0x11f   :  { %417 = vst [vmem:[%s3038_s2 + $0x78] sm:$0xff] %v353_v60  ;;  %418 = vst [vmem:[%s3038_s2 + $0x80] sm:$0xff] %v354_v23  ;;  %v371_v36 = vmul.f32 %v2519_v11, %v3812_v51  ;;  %v372_v7 = vmul.f32 %v2526_v3, %v3812_v51  ;;  %v373_v54 = vmul.f32 %v2533_v13, %v3812_v51  ;;  %v3815_v3 = vld [vmem:[#allocation4_spill] sm:$0xff] }
 0x120   :  { %419 = vst [vmem:[%s3038_s2 + $0x88] sm:$0xff] %v355_v25  ;;  %420 = vst [vmem:[%s3038_s2 + $0x90] sm:$0xff] %v356_v42  ;;  %v374_v50 = vmul.f32 %v2540_v58, %v3812_v51  ;;  %v375_v49 = vmul.f32 %v2547_v52, %v3812_v51  ;;  %v376_v22 = vmul.f32 %v2554_v34, %v3812_v51  ;;  %v3816_v58 = vld [vmem:[#allocation5_spill] sm:$0xff]  ;;  %v3817_v34 = vld [vmem:[#allocation6_spill] sm:$0xff] }
 0x121   :  { %421 = vst [vmem:[%s3038_s2 + $0x98] sm:$0xff] %v357_v45  ;;  %422 = vst [vmem:[%s3038_s2 + $0xa0] sm:$0xff] %v358_v31  ;;  %v377_v11 = vmul.f32 %v3814_v15, %v3812_v51  ;;  %v378_v13 = vmul.f32 %v3815_v3, %v3812_v51  ;;  %v379_v52 = vmul.f32 %v3816_v58, %v3812_v51 }
 0x122   :  { %423 = vst [vmem:[%s3038_s2 + $0xa8] sm:$0xff] %v359_v14  ;;  %424 = vst [vmem:[%s3038_s2 + $0xb0] sm:$0xff] %v360_v39  ;;  %v380_v62 = vmul.f32 %v3817_v34, %v3812_v51  ;;  %v381_v59 = vmul.f32 %v3818_v35, %v3812_v51  ;;  %v382_v41 = vmul.f32 %v3819_v19, %v3812_v51 }
 0x123   :  { %425 = vst [vmem:[%s3038_s2 + $0xb8] sm:$0xff] %v361_v12  ;;  %426 = vst [vmem:[%s3038_s2 + $0xc0] sm:$0xff] %v362_v48  ;;  %v383_v37 = vmul.f32 %v3820_v28, %v3812_v51  ;;  %v384_v9 = vmul.f32 %v3821_v6, %v3812_v51  ;;  %v385_v47 = vmul.f32 %v3822_v2, %v3812_v51 }
 0x124   :  { %427 = vst [vmem:[%s3038_s2 + $0xc8] sm:$0xff] %v363_v61  ;;  %428 = vst [vmem:[%s3038_s2 + $0xd0] sm:$0xff] %v364_v10  ;;  %v386_v44 = vmul.f32 %v3823_v0, %v3812_v51  ;;  %v387_v8 = vmul.f32 %v3824_v17, %v3812_v51  ;;  %v388_v32 = vmul.f32 %v3825_v55, %v3812_v51 }
 0x125   :  { %429 = vst [vmem:[%s3038_s2 + $0xd8] sm:$0xff] %v365_v63  ;;  %430 = vst [vmem:[%s3038_s2 + $0xe0] sm:$0xff] %v366_v18  ;;  %v389_v33 = vmul.f32 %v2645_v5, %v3812_v51  ;;  %v390_v26 = vmul.f32 %v2652_v1, %v3812_v51  ;;  %v3826_v5 = vld [vmem:[#allocation68_spill] sm:$0xff]  ;;  %v392_v60 = vmul.f32 %v2666_v38, %v3812_v51 }
 0x126   :  { %431 = vst [vmem:[%s3038_s2 + $0xe8] sm:$0xff] %v367_v40  ;;  %432 = vst [vmem:[%s3038_s2 + $0xf0] sm:$0xff] %v368_v21  ;;  %v391_v20 = vmul.f32 %v3826_v5, %v3812_v51  ;;  %v393_v23 = vmul.f32 %v2673_v16, %v3812_v51  ;;  %v394_v1 = vmul.f32 %v2680_v24, %v3812_v51 }
 0x127   :  { %433 = vst [vmem:[%s3038_s2 + $0xf8] sm:$0xff] %v369_v27  ;;  %434 = vst [vmem:[%s3038_s2 + $0x100] sm:$0xff] %v370_v57  ;;  %v395_v38 = vmul.f32 %v2687_v43, %v3812_v51  ;;  %v396_v16 = vmul.f32 %v2694_v46, %v3812_v51  ;;  %v397_v25 = vmul.f32 %v2701_v4, %v3812_v51 }
 0x128   :  { %435 = vst [vmem:[%s3038_s2 + $0x108] sm:$0xff] %v371_v36  ;;  %436 = vst [vmem:[%s3038_s2 + $0x110] sm:$0xff] %v372_v7  ;;  %v398_v24 = vmul.f32 %v2708_v29, %v3812_v51  ;;  %v399_v43 = vmul.f32 %v2710_v53, %v3812_v51  ;;  %v400_v46 = vmul.f32 %v2712_v56, %v3812_v51 }
 0x129   :  { %437 = vst [vmem:[%s3038_s2 + $0x118] sm:$0xff] %v373_v54  ;;  %438 = vst [vmem:[%s3038_s2 + $0x120] sm:$0xff] %v374_v50  ;;  %v401_v4 = vmul.f32 %v2714_v30, %v3812_v51 }
 0x12a   :  { %439 = vst [vmem:[%s3038_s2 + $0x128] sm:$0xff] %v375_v49  ;;  %440 = vst [vmem:[%s3038_s2 + $0x130] sm:$0xff] %v376_v22 }
 0x12b   :  { %441 = vst [vmem:[%s3038_s2 + $0x138] sm:$0xff] %v377_v11  ;;  %442 = vst [vmem:[%s3038_s2 + $0x140] sm:$0xff] %v378_v13 }
 0x12c   :  { %443 = vst [vmem:[%s3038_s2 + $0x148] sm:$0xff] %v379_v52  ;;  %444 = vst [vmem:[%s3038_s2 + $0x150] sm:$0xff] %v380_v62 }
 0x12d   :  { %445 = vst [vmem:[%s3038_s2 + $0x158] sm:$0xff] %v381_v59  ;;  %446 = vst [vmem:[%s3038_s2 + $0x160] sm:$0xff] %v382_v41 }
 0x12e   :  { %447 = vst [vmem:[%s3038_s2 + $0x168] sm:$0xff] %v383_v37  ;;  %448 = vst [vmem:[%s3038_s2 + $0x170] sm:$0xff] %v384_v9 }
 0x12f   :  { %449 = vst [vmem:[%s3038_s2 + $0x178] sm:$0xff] %v385_v47  ;;  %450 = vst [vmem:[%s3038_s2 + $0x180] sm:$0xff] %v386_v44 }
 0x130   :  { %451 = vst [vmem:[%s3038_s2 + $0x188] sm:$0xff] %v387_v8  ;;  %452 = vst [vmem:[%s3038_s2 + $0x190] sm:$0xff] %v388_v32 }
 0x131   :  { %453 = vst [vmem:[%s3038_s2 + $0x198] sm:$0xff] %v389_v33  ;;  %454 = vst [vmem:[%s3038_s2 + $0x1a0] sm:$0xff] %v390_v26 }
 0x132   :  { %455 = vst [vmem:[%s3038_s2 + $0x1a8] sm:$0xff] %v391_v20  ;;  %456 = vst [vmem:[%s3038_s2 + $0x1b0] sm:$0xff] %v392_v60 }
 0x133   :  { %457 = vst [vmem:[%s3038_s2 + $0x1b8] sm:$0xff] %v393_v23  ;;  %458 = vst [vmem:[%s3038_s2 + $0x1c0] sm:$0xff] %v394_v1 }
 0x134   :  { %459 = vst [vmem:[%s3038_s2 + $0x1c8] sm:$0xff] %v395_v38  ;;  %460 = vst [vmem:[%s3038_s2 + $0x1d0] sm:$0xff] %v396_v16 }
 0x135   :  { %461 = vst [vmem:[%s3038_s2 + $0x1d8] sm:$0xff] %v397_v25  ;;  %462 = vst [vmem:[%s3038_s2 + $0x1e0] sm:$0xff] %v398_v24 }
 0x136   :  { %463 = vst [vmem:[%s3038_s2 + $0x1e8] sm:$0xff] %v399_v43  ;;  %464 = vst [vmem:[%s3038_s2 + $0x1f0] sm:$0xff] %v400_v46 }
 0x137   :  { %465 = vst [vmem:[%s3038_s2 + $0x1f8] sm:$0xff] %v401_v4 }

// kernel: q_incept_conv.2
= control target key start
LH: loop header
LB: loop body
LE: loop exit
PB: predicated region body
PF: predicated region fallthrough
CT: control target
= control target key end

     0   :  { %s1045_s15 = smov 0   ;;  %s1047_s16 = smov 0   ;;  %s1307_s0 = inlined_call_operand.vmem [shape: bf16[2,256,36], index: 0, kind: input, shape index: {}]   ;;  %s1308_s1 = inlined_call_operand.vmem [shape: bf16[36,128], index: 1, kind: input, shape index: {}]   ;;  %s1309_s2 = inlined_call_operand.vmem [shape: f32[1,128], index: 2, kind: input, shape index: {}]   ;;  %s1310_s3 = inlined_call_operand.vmem [shape: f32[2,256,128], index: 3, kind: output, shape index: {0}]   ;;  %s1311_s4 = inlined_call_operand.vmem [shape: f32[2,1,1,1], index: 4, kind: output, shape index: {1}]  }
   0x1   :  { %s1049_s17 = smov 0  }
   0x2 LB: > { %s27_s18 = sadd.s32 1, %s1014_s16  ;;  %p841_p0 = scmp.ge.s32.totalorder %s1018_s17, 1  ;;  %s1018_s17 = sphi %s1049_s17, %s15_s17   ;;  %s1014_s16 = sphi %s1047_s16, %s1313_s16   ;;  %s1010_s15 = sphi %s1045_s15, %s1312_s15  }
   0x3   : > { %p29_p1 = scmp.ge.s32.totalorder %s27_s18, 2  ;;  %p188_p2 = scmp.lt.s32.totalorder %s1018_s17, 3 }
   0x5   : > { %s1315_s18 = smov (%p29_p1, %s27_s18), 0  ;;  %p189_p3 = pnand %p841_p0, %p188_p2 }
   0x6   : > { %p229_p4 = scmp.lt.s32.totalorder (!%p189_p3), %s1010_s15, 1 }
   0x7   : > { %192 = sbr.rel (%p189_p3) target bundleno = 468 (0x1d4), region = 32 }
   0xc   : > { %v977_v0 = vld [vmem:[%s1308_s1 + $0x10] ss:$0 sps:$4 sm:$0x33]   ;;  %vm443_vm0 = vcmask 1041408   ;;  %v978_v1 = vld [vmem:[%s1308_s1 + $0x8] sm:$0xff]   ;;  %s1317_s15 = smov (!%p229_p4, %s1010_s15), 1 }
   0xd   : > { %949 = vmatprep.subr.msk.bf16.mxu0 %vm443_vm0, %v977_v0  ;;  %v445_v2 = vsel %vm443_vm0, %v977_v0, 0  ;;  %950 = vmatprep.subr.msk.bf16.mxu1 %vm443_vm0, %v977_v0  ;;  %v979_v3 = vld [vmem:[%s1308_s1] sm:$0xff]   ;;  %s884_s25 = sshll.u32 %s1317_s15, 7  ;;  %vm394_vm1 = vcmask 293888   ;;  %s885_s5 = sshll.u32 %s1317_s15, 8  ;;  %vm713_vm2 = vcmask 0  }
   0xe   : > { %906 = vmatpush3.bf16.msra.mxu0 %v445_v2  ;;  %946 = vmatpush3.bf16.msra.mxu1 %v445_v2  ;;  %s1078_s28 = scalar_lea.vmem %s1307_s0, %s884_s25  ;;  %v1115_v20 = vld [vmem:[%s1309_s2] ss:$0 sm:$0xff]  ;;  %s1127_s8 = scalar_lea.vmem %s1310_s3, %s885_s5 }
   0xf   : > { %907 = vmatprep.subr.bf16.mxu0 %v978_v1  ;;  %944 = vmatprep.subr.bf16.mxu1 %v978_v1  ;;  %v980_v4 = vld [vmem:[%s1078_s28] sm:$0xff]   ;;  %v981_v5 = vld [vmem:[%s1078_s28 + $0x8] sm:$0xff]   ;;  %v984_v8 = vld [vmem:[%s1078_s28 + $0x10] sm:$0xff]   ;;  %s253_s11 = scalar_lea.vmem %s1311_s4, %s1317_s15 }
  0x10   : > { %911 = vmatprep.mubr.msk.bf16.mxu0 %vm394_vm1, %v980_v4  ;;  %v982_v6 = vld [vmem:[%s1078_s28 + $0x40] sm:$0xff]   ;;  %v983_v7 = vld [vmem:[%s1078_s28 + $0x48] sm:$0xff]   ;;  %v986_v9 = vld [vmem:[%s1078_s28 + $0x50] sm:$0xff]  }
  0x11   : > { %927 = vmatprep.mubr.msk.bf16.mxu1 %vm394_vm1, %v982_v6  ;;  %v985_v10 = vld [vmem:[%s1078_s28 + $0x18] sm:$0xff]   ;;  %v988_v12 = vld [vmem:[%s1078_s28 + $0x20] sm:$0xff]   ;;  %v989_v14 = vld [vmem:[%s1078_s28 + $0x28] sm:$0xff]  }
  0x12   : > { %908 = vmatpush3.bf16.msra.mxu0 %v978_v1  ;;  %947 = vmatpush3.bf16.msra.mxu1 %v978_v1  ;;  %v987_v11 = vld [vmem:[%s1078_s28 + $0x58] sm:$0xff]   ;;  %v990_v13 = vld [vmem:[%s1078_s28 + $0x60] sm:$0xff]   ;;  %v991_v15 = vld [vmem:[%s1078_s28 + $0x68] sm:$0xff]  }
  0x13   : > { %909 = vmatprep.subr.bf16.mxu0 %v979_v3  ;;  %945 = vmatprep.subr.bf16.mxu1 %v979_v3  ;;  %v992_v16 = vld [vmem:[%s1078_s28 + $0x30] sm:$0xff]   ;;  %v993_v18 = vld [vmem:[%s1078_s28 + $0x38] sm:$0xff]  }
  0x14   : > { %v994_v17 = vld [vmem:[%s1078_s28 + $0x70] sm:$0xff]   ;;  %v995_v19 = vld [vmem:[%s1078_s28 + $0x78] sm:$0xff]  }
  0x16   : > { %910 = vmatpush3.bf16.msra.mxu0 %v979_v3  ;;  %948 = vmatpush3.bf16.msra.mxu1 %v979_v3 }
  0x19   : > { %912 = vmatmul.mubr.msk.bf16.vlgmr.msra.gmra.mxu0 %vm394_vm1, %v981_v5  ;;  %928 = vmatmul.mubr.msk.bf16.vlgmr.msra.gmra.mxu1 %vm394_vm1, %v983_v7 }
  0x1a   : > { %915 = vmatprep.mubr.msk.bf16.mxu0 %vm394_vm1, %v984_v8  ;;  %931 = vmatprep.mubr.msk.bf16.mxu1 %vm394_vm1, %v986_v9 }
  0x21   : > { %916 = vmatmul.mubr.msk.bf16.gmra.mxu0 %vm394_vm1, %v985_v10  ;;  %932 = vmatmul.mubr.msk.bf16.gmra.mxu1 %vm394_vm1, %v987_v11 }
  0x22   : > { %919 = vmatprep.mubr.msk.bf16.mxu0 %vm394_vm1, %v988_v12  ;;  %935 = vmatprep.mubr.msk.bf16.mxu1 %vm394_vm1, %v990_v13 }
  0x29   : > { %920 = vmatmul.mubr.msk.bf16.gmra.mxu0 %vm394_vm1, %v989_v14  ;;  %936 = vmatmul.mubr.msk.bf16.gmra.mxu1 %vm394_vm1, %v991_v15 }
  0x2a   : > { %923 = vmatprep.mubr.msk.bf16.mxu0 %vm394_vm1, %v992_v16  ;;  %939 = vmatprep.mubr.msk.bf16.mxu1 %vm394_vm1, %v994_v17 }
  0x31   : > { %924 = vmatmul.mubr.msk.bf16.gmra.mxu0 %vm394_vm1, %v993_v18  ;;  %940 = vmatmul.mubr.msk.bf16.gmra.mxu1 %vm394_vm1, %v995_v19 }
  0xd9   : > { %v913_v21 = vpop.f32.mrf.mxu0  ;;  %v929_v22 = vpop.f32.mrf.mxu1 }
  0xda   : > { %v1119_v23 = vadd.f32 %v913_v21, %v1115_v20  ;;  %v1122_v24 = vadd.f32 %v929_v22, %v1115_v20 }
  0xdb   : > { %v481_v25 = vpop.f32.mrf.mxu0  ;;  %v545_v26 = vpop.f32.mrf.mxu1 }
  0xdc   : > { %v610_v27 = vmax.f32 %v1119_v23, 0.0  ;;  %v1131_v28 = vadd.f32 %v1115_v20, %v481_v25  ;;  %v626_v29 = vmax.f32 %v1122_v24, 0.0  ;;  %v1135_v30 = vadd.f32 %v1115_v20, %v545_v26 }
  0xdd   : > { %v914_v31 = vpop.f32.mrf.mxu0  ;;  %v930_v32 = vpop.f32.mrf.mxu1 }
  0xde   : > { %642 = vst [vmem:[%s1127_s8 + $0x10] sm:$0xff] %v610_v27  ;;  %v608_v33 = vmax.f32 %v1131_v28, 0.0  ;;  %658 = vst [vmem:[%s1127_s8 + $0x90] sm:$0xff] %v626_v29  ;;  %v1145_v34 = vadd.f32 %v914_v31, %v1115_v20  ;;  %v624_v35 = vmax.f32 %v1135_v30, 0.0  ;;  %v1149_v36 = vadd.f32 %v930_v32, %v1115_v20 }
  0xdf   : > { %v484_v37 = vpop.f32.mrf.mxu0  ;;  %v548_v38 = vpop.f32.mrf.mxu1 }
  0xe0   : > { %640 = vst [vmem:[%s1127_s8] sm:$0xff] %v608_v33  ;;  %v611_v39 = vmax.f32 %v1145_v34, 0.0  ;;  %656 = vst [vmem:[%s1127_s8 + $0x80] sm:$0xff] %v624_v35  ;;  %v1159_v40 = vadd.f32 %v1115_v20, %v484_v37  ;;  %v627_v41 = vmax.f32 %v1149_v36, 0.0  ;;  %v1163_v42 = vadd.f32 %v1115_v20, %v548_v38 }
  0xe1   : > { %v917_v43 = vpop.f32.mrf.mxu0  ;;  %v933_v44 = vpop.f32.mrf.mxu1 }
  0xe2   : > { %643 = vst [vmem:[%s1127_s8 + $0x18] sm:$0xff] %v611_v39  ;;  %v609_v45 = vmax.f32 %v1159_v40, 0.0  ;;  %659 = vst [vmem:[%s1127_s8 + $0x98] sm:$0xff] %v627_v41  ;;  %v506_v46 = vadd.f32 %v917_v43, %v1115_v20  ;;  %v625_v47 = vmax.f32 %v1163_v42, 0.0  ;;  %v1175_v48 = vadd.f32 %v933_v44, %v1115_v20 }
  0xe3   : > { %v497_v49 = vpop.f32.mrf.mxu0  ;;  %v561_v50 = vpop.f32.mrf.mxu1 }
  0xe4   : > { %641 = vst [vmem:[%s1127_s8 + $0x8] sm:$0xff] %v609_v45  ;;  %v614_v51 = vmax.f32 %v506_v46, 0.0  ;;  %657 = vst [vmem:[%s1127_s8 + $0x88] sm:$0xff] %v625_v47  ;;  %v498_v52 = vadd.f32 %v1115_v20, %v497_v49  ;;  %v630_v53 = vmax.f32 %v1175_v48, 0.0  ;;  %v1186_v54 = vadd.f32 %v1115_v20, %v561_v50 }
  0xe5   : > { %v918_v55 = vpop.f32.mrf.mxu0  ;;  %v934_v56 = vpop.f32.mrf.mxu1 }
  0xe6   : > { %646 = vst [vmem:[%s1127_s8 + $0x30] sm:$0xff] %v614_v51  ;;  %v612_v57 = vmax.f32 %v498_v52, 0.0  ;;  %662 = vst [vmem:[%s1127_s8 + $0xb0] sm:$0xff] %v630_v53  ;;  %v509_v58 = vadd.f32 %v918_v55, %v1115_v20  ;;  %v628_v59 = vmax.f32 %v1186_v54, 0.0  ;;  %v1195_v61 = vadd.f32 %v934_v56, %v1115_v20 }
  0xe7   : > { %v500_v60 = vpop.f32.mrf.mxu0  ;;  %v564_v62 = vpop.f32.mrf.mxu1  ;;  %v674_v44 = vmax.f32 %v610_v27, %v614_v51 }
  0xe8   : > { %644 = vst [vmem:[%s1127_s8 + $0x20] sm:$0xff] %v612_v57  ;;  %v615_v63 = vmax.f32 %v509_v58, 0.0  ;;  %660 = vst [vmem:[%s1127_s8 + $0xa0] sm:$0xff] %v628_v59  ;;  %v1202_v0 = vadd.f32 %v1115_v20, %v500_v60  ;;  %v1205_v1 = vadd.f32 %v1115_v20, %v564_v62  ;;  %v631_v2 = vmax.f32 %v1195_v61, 0.0 }
  0xe9   : > { %v921_v3 = vpop.f32.mrf.mxu0  ;;  %v937_v4 = vpop.f32.mrf.mxu1  ;;  %v672_v52 = vmax.f32 %v608_v33, %v612_v57 }
  0xea   : > { %647 = vst [vmem:[%s1127_s8 + $0x38] sm:$0xff] %v615_v63  ;;  %v613_v5 = vmax.f32 %v1202_v0, 0.0  ;;  %v522_v6 = vadd.f32 %v921_v3, %v1115_v20  ;;  %v629_v7 = vmax.f32 %v1205_v1, 0.0  ;;  %663 = vst [vmem:[%s1127_s8 + $0xb8] sm:$0xff] %v631_v2  ;;  %v1216_v9 = vadd.f32 %v937_v4, %v1115_v20 }
  0xeb   : > { %v513_v8 = vpop.f32.mrf.mxu0  ;;  %v577_v10 = vpop.f32.mrf.mxu1  ;;  %v675_v51 = vmax.f32 %v611_v39, %v615_v63 }
  0xec   : > { %645 = vst [vmem:[%s1127_s8 + $0x28] sm:$0xff] %v613_v5  ;;  %v618_v11 = vmax.f32 %v522_v6, 0.0  ;;  %661 = vst [vmem:[%s1127_s8 + $0xa8] sm:$0xff] %v629_v7  ;;  %v514_v12 = vadd.f32 %v1115_v20, %v513_v8  ;;  %v1224_v13 = vadd.f32 %v1115_v20, %v577_v10  ;;  %v634_v14 = vmax.f32 %v1216_v9, 0.0 }
  0xed   : > { %v922_v15 = vpop.f32.mrf.mxu0  ;;  %v938_v16 = vpop.f32.mrf.mxu1  ;;  %v673_v10 = vmax.f32 %v609_v45, %v613_v5 }
  0xee   : > { %650 = vst [vmem:[%s1127_s8 + $0x50] sm:$0xff] %v618_v11  ;;  %v616_v17 = vmax.f32 %v514_v12, 0.0  ;;  %v525_v18 = vadd.f32 %v922_v15, %v1115_v20  ;;  %v632_v19 = vmax.f32 %v1224_v13, 0.0  ;;  %666 = vst [vmem:[%s1127_s8 + $0xd0] sm:$0xff] %v634_v14  ;;  %v1234_v22 = vadd.f32 %v938_v16, %v1115_v20 }
  0xef   : > { %v516_v21 = vpop.f32.mrf.mxu0  ;;  %v580_v25 = vpop.f32.mrf.mxu1  ;;  %v678_v60 = vmax.f32 %v674_v44, %v618_v11 }
  0xf0   : > { %648 = vst [vmem:[%s1127_s8 + $0x40] sm:$0xff] %v616_v17  ;;  %v619_v26 = vmax.f32 %v525_v18, 0.0  ;;  %664 = vst [vmem:[%s1127_s8 + $0xc0] sm:$0xff] %v632_v19  ;;  %v517_v31 = vadd.f32 %v1115_v20, %v516_v21  ;;  %v1242_v32 = vadd.f32 %v1115_v20, %v580_v25  ;;  %v635_v37 = vmax.f32 %v1234_v22, 0.0 }
  0xf1   : > { %v925_v38 = vpop.f32.mrf.mxu0  ;;  %v941_v43 = vpop.f32.mrf.mxu1  ;;  %v676_v28 = vmax.f32 %v672_v52, %v616_v17 }
  0xf2   : > { %651 = vst [vmem:[%s1127_s8 + $0x58] sm:$0xff] %v619_v26  ;;  %v617_v46 = vmax.f32 %v517_v31, 0.0  ;;  %v538_v49 = vadd.f32 %v925_v38, %v1115_v20  ;;  %v633_v50 = vmax.f32 %v1242_v32, 0.0  ;;  %667 = vst [vmem:[%s1127_s8 + $0xd8] sm:$0xff] %v635_v37  ;;  %v602_v56 = vadd.f32 %v941_v43, %v1115_v20 }
  0xf3   : > { %v529_v55 = vpop.f32.mrf.mxu0  ;;  %v593_v58 = vpop.f32.mrf.mxu1  ;;  %v679_v11 = vmax.f32 %v675_v51, %v619_v26 }
  0xf4   : > { %649 = vst [vmem:[%s1127_s8 + $0x48] sm:$0xff] %v617_v46  ;;  %v622_v62 = vmax.f32 %v538_v49, 0.0  ;;  %665 = vst [vmem:[%s1127_s8 + $0xc8] sm:$0xff] %v633_v50  ;;  %v530_v23 = vadd.f32 %v1115_v20, %v529_v55  ;;  %v594_v27 = vadd.f32 %v1115_v20, %v593_v58  ;;  %v638_v33 = vmax.f32 %v602_v56, 0.0 }
  0xf5   : > { %v926_v57 = vpop.f32.mrf.mxu0  ;;  %v942_v0 = vpop.f32.mrf.mxu1  ;;  %v677_v17 = vmax.f32 %v673_v10, %v617_v46 }
  0xf6   : > { %654 = vst [vmem:[%s1127_s8 + $0x70] sm:$0xff] %v622_v62  ;;  %v682_v3 = vmax.f32 %v678_v60, %v622_v62  ;;  %v620_v4 = vmax.f32 %v530_v23, 0.0  ;;  %v541_v6 = vadd.f32 %v926_v57, %v1115_v20  ;;  %v636_v8 = vmax.f32 %v594_v27, 0.0  ;;  %670 = vst [vmem:[%s1127_s8 + $0xf0] sm:$0xff] %v638_v33 }
  0xf7   : > { %v532_v34 = vpop.f32.mrf.mxu0  ;;  %v605_v39 = vadd.f32 %v942_v0, %v1115_v20  ;;  %v596_v63 = vpop.f32.mrf.mxu1 }
  0xf8   : > { %v686_v12 = vmax.f32 %v682_v3, %v626_v29  ;;  %652 = vst [vmem:[%s1127_s8 + $0x60] sm:$0xff] %v620_v4  ;;  %v680_v15 = vmax.f32 %v676_v28, %v620_v4  ;;  %v623_v16 = vmax.f32 %v541_v6, 0.0  ;;  %668 = vst [vmem:[%s1127_s8 + $0xe0] sm:$0xff] %v636_v8  ;;  %v533_v40 = vadd.f32 %v1115_v20, %v532_v34 }
  0xf9   : > { %v639_v45 = vmax.f32 %v605_v39, 0.0  ;;  %v597_v5 = vadd.f32 %v1115_v20, %v596_v63 }
  0xfa   : > { %v684_v18 = vmax.f32 %v680_v15, %v624_v35  ;;  %655 = vst [vmem:[%s1127_s8 + $0x78] sm:$0xff] %v623_v16  ;;  %v683_v21 = vmax.f32 %v679_v11, %v623_v16  ;;  %v621_v22 = vmax.f32 %v533_v40, 0.0  ;;  %v690_v29 = vmax.f32 %v686_v12, %v630_v53 }
  0xfb   : > { %671 = vst [vmem:[%s1127_s8 + $0xf8] sm:$0xff] %v639_v45  ;;  %v637_v24 = vmax.f32 %v597_v5, 0.0 }
  0xfc   : > { %v687_v25 = vmax.f32 %v683_v21, %v627_v41  ;;  %v688_v26 = vmax.f32 %v684_v18, %v628_v59  ;;  %653 = vst [vmem:[%s1127_s8 + $0x68] sm:$0xff] %v621_v22  ;;  %v681_v20 = vmax.f32 %v677_v17, %v621_v22  ;;  %v694_v31 = vmax.f32 %v690_v29, %v634_v14 }
  0xfd   : > { %669 = vst [vmem:[%s1127_s8 + $0xe8] sm:$0xff] %v637_v24 }
  0xfe   : > { %v685_v30 = vmax.f32 %v681_v20, %v625_v47  ;;  %v691_v35 = vmax.f32 %v687_v25, %v631_v2  ;;  %v692_v48 = vmax.f32 %v688_v26, %v632_v19  ;;  %v698_v59 = vmax.f32 %v694_v31, %v638_v33 }
 0x100   : > { %v695_v36 = vmax.f32 %v691_v35, %v635_v37  ;;  %v689_v41 = vmax.f32 %v685_v30, %v629_v7  ;;  %v696_v32 = vmax.f32 %v692_v48, %v636_v8 }
 0x102   : > { %v699_v53 = vmax.f32 %v695_v36, %v639_v45  ;;  %v693_v54 = vmax.f32 %v689_v41, %v633_v50 }
 0x104   : > { %v697_v42 = vmax.f32 %v693_v54, %v637_v24  ;;  %v701_v38 = vmax.f32 %v698_v59, %v699_v53 }
 0x106   : > { %v700_v47 = vmax.f32 %v696_v32, %v697_v42 }
 0x108   : > { %v702_v61 = vmax.f32 %v700_v47, %v701_v38 }
 0x10a   : > { %703 = vmax.xlane.f32.xlu0 %v702_v61 }
 0x193   : > { %v704_v2 = vpop.xlane.xlu0 %703 }
 0x194   : > { %v705_v9 = vrot.slane %v704_v2, 4 }
 0x196   : > { %v706_v14 = vmax.f32 %v704_v2, %v705_v9 }
 0x198   : > { %v707_v43 = vrot.slane %v706_v14, 2 }
 0x19a   : > { %v708_v13 = vmax.f32 %v706_v14, %v707_v43 }
 0x19c   : > { %v709_v19 = vrot.slane %v708_v13, 1 }
 0x19e   : > { %v710_v37 = vmax.f32 %v708_v13, %v709_v19 }
 0x1a0   : > { %951 = vpush %v710_v37 }
 0x1d1   : > { %s952_s12 = spop %951 }
 0x1d2   : > { %v712_v1 = vstv %s952_s12 }
 0x1d3   : > { %714 = vst.msk [vmem:[%s253_s11] sm:$0x1] %vm713_vm2, %v712_v1 }
 0x1d4 PF: > { %s15_s17 = sadd.s32 1, %s1018_s17   ;;  %s1312_s15 = smov %s1014_s16 }
 0x1d5   : > { %p12_p5 = scmp.ge.s32.totalorder %s15_s17, 4   ;;  %s1313_s16 = smov %s1315_s18 }
 0x1d7   :  { %14 = sbr.rel (!%p12_p5) target bundleno = 2 (0x2), region = 74 }

</bundles_post_ra>
